<compile_context>
chip_gen: v7x
topology: tpu7x:2x2x1
jax: 0.10.0
libtpu: 0.0.40
codegen_flags: <defaults>
</compile_context>

<pallas_src>
import functools

import jax
import jax.numpy as jnp
import numpy as np
from jax.experimental import pallas as pl
from jax.experimental.pallas import tpu as pltpu

N_DOTS = 9
C = 3
# ImageNet normalization constants hard-coded in ImageDot / inv_normalize.
MEANS = (0.485, 0.456, 0.406)
STDS = (0.229, 0.224, 0.225)

# VMEM plane accounting (each plane = TH x W f32 unless noted).
_PIPELINE_PLANES = C * 2 * 2      # double-buffered input + output image blocks
_SCRATCH_PLANES = 2 * C           # a_sc + b_sc coefficient planes
_COEFF_TMP_PLANES = 10            # trans / 3x src / d / mask / a / keep live temporaries


def _attack_front_kernel(H_total, alpha_ref, beta_ref, radius_ref, center_ref,
                         color_ref, x_ref, o_ref, a_sc, b_sc):
    """grid = (H_tiles, B)  — batch MUST be the innermost ("arbitrary") axis.

    alpha_ref  : (9,)   f32 SMEM
    beta_ref   : (9,)   f32 SMEM
    radius_ref : (9,)   f32 SMEM
    center_ref : (9, 2) f32 SMEM   centers in [0,1] (row, col), scaled by (H-1, W-1)
    color_ref  : (9, 3) f32 SMEM   dot RGB colors in [0,1]
    x_ref/o_ref: (1, 3, TH, W) VMEM image tile
    a_sc, b_sc : (3, TH, W) f32 VMEM scratch — per-pixel affine coefficients,
                 computed once per H-tile (batch program_id == 0) and reused for
                 every batch element.
    """
    _, _, TH, W = x_ref.shape
    ht = pl.program_id(0)
    b = pl.program_id(1)
    # NOTE: program_id must stay OUTSIDE the pl.when body (a cond branch); the
    # derived scalar is closed over instead.
    row0 = ht * TH

    @pl.when(b == 0)
    def _compute_coefficients():
        # Separable pixel coordinates: (TH,1) row column and (1,W) lane row.
        row = (jax.lax.broadcasted_iota(jnp.int32, (TH, 1), 0) + row0).astype(jnp.float32)
        col = jax.lax.broadcasted_iota(jnp.int32, (1, W), 1).astype(jnp.float32)

        # Single-pass accumulation of transmission T = prod(1 - a_i) and the
        # per-channel source term S_c (same recursion as the sequential blend
        # with x := 1 and x := 0 respectively).
        trans = jnp.ones((TH, W), jnp.float32)
        src = [jnp.zeros((TH, W), jnp.float32) for _ in range(C)]

        for idx in range(N_DOTS):
            cy = center_ref[idx, 0] * jnp.float32(H_total - 1)
            cx = center_ref[idx, 1] * jnp.float32(W - 1)
            beta = beta_ref[idx] * 2.0
            radius = radius_ref[idx] * 25.0
            alpha = alpha_ref[idx] * 0.3
            inv_r2 = 1.0 / (radius * radius)

            dh2 = (row - cy) ** 2                       # (TH, 1)
            dw2 = (col - cx) ** 2                       # (1, W)
            d = (dh2 + dw2) * inv_r2                    # (TH, W) broadcast add
            mask = jnp.exp(-jnp.power(d, beta) + 1e-10)
            a = alpha * mask
            keep = 1.0 - a
            trans = trans * keep
            for c in range(C):
                # _normalize_color: (color - mean) / std
                colr = (color_ref[idx, c] - MEANS[c]) / STDS[c]
                src[c] = keep * src[c] + a * colr

        # Fold inv_normalize (out = blended * std + mean) into the coefficients:
        #   out_c = x_c * (std_c * T) + (std_c * S_c + mean_c)
        for c in range(C):
            a_sc[c, :, :] = trans * STDS[c]
            b_sc[c, :, :] = src[c] * STDS[c] + MEANS[c]

    # Per-batch hot path: one fused multiply-add per channel per pixel.
    o_ref[0] = (x_ref[0] * a_sc[...] + b_sc[...]).astype(o_ref.dtype)


def _vmem_capacity_bytes():
    try:
        return int(pltpu.get_tpu_info().vmem_capacity_bytes)
    except Exception:
        return 64 * 1024 * 1024      # conservative (v7x per-core VMEM)


def _pick_tile_h(H, W, img_dtype_bytes, budget_bytes):
    """Largest H-tile that divides H, is a multiple of 8, fits the VMEM budget
    (pipeline buffers + coefficient scratch + coefficient-phase temporaries),
    and — when possible — leaves >= 2 H-tiles so both v7x TensorCores get work."""
    if H % 8 != 0:
        return H                      # block == full dim is always legal

    def cost(th):
        img = th * W * img_dtype_bytes * _PIPELINE_PLANES
        f32 = th * W * 4 * (_SCRATCH_PLANES + _COEFF_TMP_PLANES)
        return img + f32

    cands = [th for th in range(8, H + 1, 8) if H % th == 0 and cost(th) <= budget_bytes]
    if not cands:
        return 8
    multi = [th for th in cands if H // th >= 2]   # megacore: keep >= 2 parallel tiles
    return max(multi) if multi else max(cands)


def attack_model_front_preproc(fronts, alpha, beta, radius, center, color):
    """Pallas implementation of ImageDot + inverse normalization (AttackModel front path).

    NOTE: W (lane axis) should be a multiple of 128 for lane-dense stores; typical
    TransFuser front widths satisfy this.  Output dtype follows `fronts.dtype`
    (bf16 inputs get a narrowed store; arithmetic stays f32).
    """
    B, Cc, H, W = fronts.shape
    assert Cc == C

    cap = _vmem_capacity_bytes()
    img_bytes = jnp.dtype(fronts.dtype).itemsize
    TH = _pick_tile_h(H, W, img_bytes, budget_bytes=int(cap * 0.4))
    HT = H // TH
    # Scoped-VMEM limit: covers the tile footprint on v5e (16 MiB default), stays
    # well inside v7x's 64 MiB physical per-core VMEM.
    vmem_limit = min(int(cap * 3 // 4), 100 * 1024 * 1024)

    smem = pl.BlockSpec(memory_space=pltpu.MemorySpace.SMEM)
    img_spec = pl.BlockSpec((1, C, TH, W), lambda ht, b: (b, 0, ht, 0))
    kernel = functools.partial(_attack_front_kernel, H)
    f32 = jnp.float32

    return pl.pallas_call(
        kernel,
        out_shape=jax.ShapeDtypeStruct((B, C, H, W), fronts.dtype),
        grid=(HT, B),
        in_specs=[smem, smem, smem, smem, smem, img_spec],
        out_specs=img_spec,
        scratch_shapes=[pltpu.VMEM((C, TH, W), jnp.float32),
                        pltpu.VMEM((C, TH, W), jnp.float32)],
        compiler_params=pltpu.CompilerParams(
            # H-tiles are independent -> shard across TensorCores (v7x megacore);
            # batch axis carries the coefficient scratch -> "arbitrary" + innermost.
            dimension_semantics=("parallel", "arbitrary"),
            vmem_limit_bytes=vmem_limit),
    )(alpha.astype(f32), beta.astype(f32), radius.astype(f32),
      center.astype(f32), color.astype(f32), fronts)


def _reference(fronts, alpha, beta, radius, center, color):
    """Pure-JAX reference mirroring the PyTorch module (sequential blend)."""
    B, _, H, W = fronts.shape
    hv, wv = jnp.meshgrid(jnp.arange(H, dtype=jnp.float32),
                          jnp.arange(W, dtype=jnp.float32), indexing="ij")
    blended = fronts.astype(jnp.float32)
    for idx in range(N_DOTS):
        cy = center[idx, 0] * (H - 1)
        cx = center[idx, 1] * (W - 1)
        d = ((hv - cy) ** 2 + (wv - cx) ** 2) / (radius[idx] * 25.0) ** 2
        mask = jnp.exp(-jnp.power(d, beta[idx] * 2.0) + 1e-10)
        a = (alpha[idx] * 0.3) * mask                               # (H, W)
        col = (color[idx] - jnp.array(MEANS)) / jnp.array(STDS)     # (3,)
        a4 = a[None, None, :, :]
        col4 = col[None, :, None, None]
        blended = (1.0 - a4) * blended + a4 * col4
    stds = jnp.array(STDS)[None, :, None, None]
    means = jnp.array(MEANS)[None, :, None, None]
    return blended * stds + means


if __name__ == "__main__":
    key = jax.random.PRNGKey(0)
    B, H, W = 2, 16, 128
    fronts = jax.random.uniform(key, (B, C, H, W), dtype=jnp.float32)

    # Deterministic parameter init, exactly as in ImageDot.__init__.
    alpha = jnp.ones((N_DOTS,), jnp.float32)
    radius = jnp.ones((N_DOTS,), jnp.float32)
    beta = jnp.ones((N_DOTS,), jnp.float32)
    center = jnp.array([[0.25, 0.25], [0.25, 0.5], [0.25, 0.75],
                        [0.5, 0.25], [0.5, 0.5], [0.5, 0.75],
                        [0.75, 0.25], [0.75, 0.5], [0.75, 0.75]], jnp.float32)
    color = jnp.full((N_DOTS, C), 0.5, jnp.float32)

    out = attack_model_front_preproc(fronts, alpha, beta, radius, center, color)
    out = jax.block_until_ready(out)

    ref = jax.block_until_ready(_reference(fronts, alpha, beta, radius, center, color))
    np.testing.assert_allclose(np.asarray(out), np.asarray(ref), rtol=1e-4, atol=1e-5)

    print("KERNEL_OK")
</pallas_src>

<mosaic_0001>
module attributes {stable_mosaic.version = 11 : i64} {
  func.func @_attack_front_kernel(%arg0: i32, %arg1: i32, %arg2: memref<9xf32, #tpu.memory_space<smem>>, %arg3: memref<9xf32, #tpu.memory_space<smem>>, %arg4: memref<9xf32, #tpu.memory_space<smem>>, %arg5: memref<9x2xf32, #tpu.memory_space<smem>>, %arg6: memref<9x3xf32, #tpu.memory_space<smem>>, %arg7: memref<1x3x8x128xf32, #tpu.memory_space<vmem>>, %arg8: memref<1x3x8x128xf32, #tpu.memory_space<vmem>>, %arg9: memref<3x8x128xf32, #tpu.memory_space<vmem>>, %arg10: memref<3x8x128xf32, #tpu.memory_space<vmem>>) attributes {dimension_semantics = [#tpu.dimension_semantics<parallel>, #tpu.dimension_semantics<arbitrary>], iteration_bounds = array<i64: 2, 2>, scalar_prefetch = 0 : i64, scratch_operands = 2 : i64, tpu.core_type = #tpu.core_type<tc>, window_params = [{transform_indices = @transform_0, window_bounds = array<i64: 9>}, {transform_indices = @transform_1, window_bounds = array<i64: 9>}, {transform_indices = @transform_2, window_bounds = array<i64: 9>}, {transform_indices = @transform_3, window_bounds = array<i64: 9, 2>}, {transform_indices = @transform_4, window_bounds = array<i64: 9, 3>}, {transform_indices = @transform_5, window_bounds = array<i64: 1, 3, 8, 128>}, {transform_indices = @transform_6, window_bounds = array<i64: 1, 3, 8, 128>}]} {
    %c8_i32 = arith.constant 8 : i32
    %0 = arith.muli %arg0, %c8_i32 : i32
    %c0_i32 = arith.constant 0 : i32
    %1 = arith.cmpi eq, %arg1, %c0_i32 : i32
    %2 = arith.extui %1 : i1 to i32
    %c0_i32_0 = arith.constant 0 : i32
    %3 = arith.cmpi ne, %2, %c0_i32_0 : i32
    scf.if %3 {
      %13 = tpu.iota {dimensions = array<i32: 0>} : vector<8x1xi32>
      %14 = vector.broadcast %0 : i32 to vector<8x1xi32>
      %15 = arith.addi %13, %14 : vector<8x1xi32>
      %16 = arith.sitofp %15 : vector<8x1xi32> to vector<8x1xf32>
      %17 = tpu.iota {dimensions = array<i32: 1>} : vector<1x128xi32>
      %18 = arith.sitofp %17 : vector<1x128xi32> to vector<1x128xf32>
      %cst = arith.constant 1.000000e+00 : f32
      %19 = vector.broadcast %cst : f32 to vector<8x128xf32>
      %cst_14 = arith.constant 0.000000e+00 : f32
      %20 = vector.broadcast %cst_14 : f32 to vector<8x128xf32>
      %cst_15 = arith.constant 0.000000e+00 : f32
      %21 = vector.broadcast %cst_15 : f32 to vector<8x128xf32>
      %cst_16 = arith.constant 0.000000e+00 : f32
      %22 = vector.broadcast %cst_16 : f32 to vector<8x128xf32>
      %c0_17 = arith.constant 0 : index
      %c0_18 = arith.constant 0 : index
      %23 = memref.load %arg5[%c0_17, %c0_18] : memref<9x2xf32, #tpu.memory_space<smem>>
      %cst_19 = arith.constant 1.500000e+01 : f32
      %24 = arith.mulf %23, %cst_19 : f32
      %c0_20 = arith.constant 0 : index
      %c1 = arith.constant 1 : index
      %25 = memref.load %arg5[%c0_20, %c1] : memref<9x2xf32, #tpu.memory_space<smem>>
      %cst_21 = arith.constant 1.270000e+02 : f32
      %26 = arith.mulf %25, %cst_21 : f32
      %c0_22 = arith.constant 0 : index
      %27 = memref.load %arg3[%c0_22] : memref<9xf32, #tpu.memory_space<smem>>
      %cst_23 = arith.constant 2.000000e+00 : f32
      %28 = arith.mulf %27, %cst_23 : f32
      %c0_24 = arith.constant 0 : index
      %29 = memref.load %arg4[%c0_24] : memref<9xf32, #tpu.memory_space<smem>>
      %cst_25 = arith.constant 2.500000e+01 : f32
      %30 = arith.mulf %29, %cst_25 : f32
      %c0_26 = arith.constant 0 : index
      %31 = memref.load %arg2[%c0_26] : memref<9xf32, #tpu.memory_space<smem>>
      %cst_27 = arith.constant 3.000000e-01 : f32
      %32 = arith.mulf %31, %cst_27 : f32
      %33 = arith.mulf %30, %30 : f32
      %cst_28 = arith.constant 1.000000e+00 : f32
      %34 = arith.divf %cst_28, %33 : f32
      %35 = vector.broadcast %24 : f32 to vector<8x1xf32>
      %36 = arith.subf %16, %35 : vector<8x1xf32>
      %37 = arith.mulf %36, %36 : vector<8x1xf32>
      %38 = vector.broadcast %26 : f32 to vector<1x128xf32>
      %39 = arith.subf %18, %38 : vector<1x128xf32>
      %40 = arith.mulf %39, %39 : vector<1x128xf32>
      %41 = vector.broadcast %37 : vector<8x1xf32> to vector<8x128xf32>
      %42 = vector.broadcast %40 : vector<1x128xf32> to vector<8x128xf32>
      %43 = arith.addf %41, %42 : vector<8x128xf32>
      %44 = vector.broadcast %34 : f32 to vector<8x128xf32>
      %45 = arith.mulf %43, %44 : vector<8x128xf32>
      %46 = vector.broadcast %28 : f32 to vector<8x128xf32>
      %47 = math.powf %45, %46 : vector<8x128xf32>
      %cst_29 = arith.constant 0.000000e+00 : f32
      %48 = vector.broadcast %cst_29 : f32 to vector<8x128xf32>
      %49 = arith.subf %48, %47 : vector<8x128xf32>
      %cst_30 = arith.constant 1.000000e-10 : f32
      %50 = vector.broadcast %cst_30 : f32 to vector<8x128xf32>
      %51 = arith.addf %49, %50 : vector<8x128xf32>
      %52 = math.exp %51 : vector<8x128xf32>
      %53 = vector.broadcast %32 : f32 to vector<8x128xf32>
      %54 = arith.mulf %53, %52 : vector<8x128xf32>
      %cst_31 = arith.constant 1.000000e+00 : f32
      %55 = vector.broadcast %cst_31 : f32 to vector<8x128xf32>
      %56 = arith.subf %55, %54 : vector<8x128xf32>
      %57 = arith.mulf %19, %56 : vector<8x128xf32>
      %c0_32 = arith.constant 0 : index
      %c0_33 = arith.constant 0 : index
      %58 = memref.load %arg6[%c0_32, %c0_33] : memref<9x3xf32, #tpu.memory_space<smem>>
      %cst_34 = arith.constant 4.850000e-01 : f32
      %59 = arith.subf %58, %cst_34 : f32
      %cst_35 = arith.constant 2.290000e-01 : f32
      %60 = arith.divf %59, %cst_35 : f32
      %61 = arith.mulf %56, %20 : vector<8x128xf32>
      %62 = vector.broadcast %60 : f32 to vector<8x128xf32>
      %63 = arith.mulf %54, %62 : vector<8x128xf32>
      %64 = arith.addf %61, %63 : vector<8x128xf32>
      %c0_36 = arith.constant 0 : index
      %c1_37 = arith.constant 1 : index
      %65 = memref.load %arg6[%c0_36, %c1_37] : memref<9x3xf32, #tpu.memory_space<smem>>
      %cst_38 = arith.constant 4.560000e-01 : f32
      %66 = arith.subf %65, %cst_38 : f32
      %cst_39 = arith.constant 2.240000e-01 : f32
      %67 = arith.divf %66, %cst_39 : f32
      %68 = arith.mulf %56, %21 : vector<8x128xf32>
      %69 = vector.broadcast %67 : f32 to vector<8x128xf32>
      %70 = arith.mulf %54, %69 : vector<8x128xf32>
      %71 = arith.addf %68, %70 : vector<8x128xf32>
      %c0_40 = arith.constant 0 : index
      %c2 = arith.constant 2 : index
      %72 = memref.load %arg6[%c0_40, %c2] : memref<9x3xf32, #tpu.memory_space<smem>>
      %cst_41 = arith.constant 4.060000e-01 : f32
      %73 = arith.subf %72, %cst_41 : f32
      %cst_42 = arith.constant 2.250000e-01 : f32
      %74 = arith.divf %73, %cst_42 : f32
      %75 = arith.mulf %56, %22 : vector<8x128xf32>
      %76 = vector.broadcast %74 : f32 to vector<8x128xf32>
      %77 = arith.mulf %54, %76 : vector<8x128xf32>
      %78 = arith.addf %75, %77 : vector<8x128xf32>
      %c1_43 = arith.constant 1 : index
      %c0_44 = arith.constant 0 : index
      %79 = memref.load %arg5[%c1_43, %c0_44] : memref<9x2xf32, #tpu.memory_space<smem>>
      %cst_45 = arith.constant 1.500000e+01 : f32
      %80 = arith.mulf %79, %cst_45 : f32
      %c1_46 = arith.constant 1 : index
      %c1_47 = arith.constant 1 : index
      %81 = memref.load %arg5[%c1_46, %c1_47] : memref<9x2xf32, #tpu.memory_space<smem>>
      %cst_48 = arith.constant 1.270000e+02 : f32
      %82 = arith.mulf %81, %cst_48 : f32
      %c1_49 = arith.constant 1 : index
      %83 = memref.load %arg3[%c1_49] : memref<9xf32, #tpu.memory_space<smem>>
      %cst_50 = arith.constant 2.000000e+00 : f32
      %84 = arith.mulf %83, %cst_50 : f32
      %c1_51 = arith.constant 1 : index
      %85 = memref.load %arg4[%c1_51] : memref<9xf32, #tpu.memory_space<smem>>
      %cst_52 = arith.constant 2.500000e+01 : f32
      %86 = arith.mulf %85, %cst_52 : f32
      %c1_53 = arith.constant 1 : index
      %87 = memref.load %arg2[%c1_53] : memref<9xf32, #tpu.memory_space<smem>>
      %cst_54 = arith.constant 3.000000e-01 : f32
      %88 = arith.mulf %87, %cst_54 : f32
      %89 = arith.mulf %86, %86 : f32
      %cst_55 = arith.constant 1.000000e+00 : f32
      %90 = arith.divf %cst_55, %89 : f32
      %91 = vector.broadcast %80 : f32 to vector<8x1xf32>
      %92 = arith.subf %16, %91 : vector<8x1xf32>
      %93 = arith.mulf %92, %92 : vector<8x1xf32>
      %94 = vector.broadcast %82 : f32 to vector<1x128xf32>
      %95 = arith.subf %18, %94 : vector<1x128xf32>
      %96 = arith.mulf %95, %95 : vector<1x128xf32>
      %97 = vector.broadcast %93 : vector<8x1xf32> to vector<8x128xf32>
      %98 = vector.broadcast %96 : vector<1x128xf32> to vector<8x128xf32>
      %99 = arith.addf %97, %98 : vector<8x128xf32>
      %100 = vector.broadcast %90 : f32 to vector<8x128xf32>
      %101 = arith.mulf %99, %100 : vector<8x128xf32>
      %102 = vector.broadcast %84 : f32 to vector<8x128xf32>
      %103 = math.powf %101, %102 : vector<8x128xf32>
      %cst_56 = arith.constant 0.000000e+00 : f32
      %104 = vector.broadcast %cst_56 : f32 to vector<8x128xf32>
      %105 = arith.subf %104, %103 : vector<8x128xf32>
      %cst_57 = arith.constant 1.000000e-10 : f32
      %106 = vector.broadcast %cst_57 : f32 to vector<8x128xf32>
      %107 = arith.addf %105, %106 : vector<8x128xf32>
      %108 = math.exp %107 : vector<8x128xf32>
      %109 = vector.broadcast %88 : f32 to vector<8x128xf32>
      %110 = arith.mulf %109, %108 : vector<8x128xf32>
      %cst_58 = arith.constant 1.000000e+00 : f32
      %111 = vector.broadcast %cst_58 : f32 to vector<8x128xf32>
      %112 = arith.subf %111, %110 : vector<8x128xf32>
      %113 = arith.mulf %57, %112 : vector<8x128xf32>
      %c1_59 = arith.constant 1 : index
      %c0_60 = arith.constant 0 : index
      %114 = memref.load %arg6[%c1_59, %c0_60] : memref<9x3xf32, #tpu.memory_space<smem>>
      %cst_61 = arith.constant 4.850000e-01 : f32
      %115 = arith.subf %114, %cst_61 : f32
      %cst_62 = arith.constant 2.290000e-01 : f32
      %116 = arith.divf %115, %cst_62 : f32
      %117 = arith.mulf %112, %64 : vector<8x128xf32>
      %118 = vector.broadcast %116 : f32 to vector<8x128xf32>
      %119 = arith.mulf %110, %118 : vector<8x128xf32>
      %120 = arith.addf %117, %119 : vector<8x128xf32>
      %c1_63 = arith.constant 1 : index
      %c1_64 = arith.constant 1 : index
      %121 = memref.load %arg6[%c1_63, %c1_64] : memref<9x3xf32, #tpu.memory_space<smem>>
      %cst_65 = arith.constant 4.560000e-01 : f32
      %122 = arith.subf %121, %cst_65 : f32
      %cst_66 = arith.constant 2.240000e-01 : f32
      %123 = arith.divf %122, %cst_66 : f32
      %124 = arith.mulf %112, %71 : vector<8x128xf32>
      %125 = vector.broadcast %123 : f32 to vector<8x128xf32>
      %126 = arith.mulf %110, %125 : vector<8x128xf32>
      %127 = arith.addf %124, %126 : vector<8x128xf32>
      %c1_67 = arith.constant 1 : index
      %c2_68 = arith.constant 2 : index
      %128 = memref.load %arg6[%c1_67, %c2_68] : memref<9x3xf32, #tpu.memory_space<smem>>
      %cst_69 = arith.constant 4.060000e-01 : f32
      %129 = arith.subf %128, %cst_69 : f32
      %cst_70 = arith.constant 2.250000e-01 : f32
      %130 = arith.divf %129, %cst_70 : f32
      %131 = arith.mulf %112, %78 : vector<8x128xf32>
      %132 = vector.broadcast %130 : f32 to vector<8x128xf32>
      %133 = arith.mulf %110, %132 : vector<8x128xf32>
      %134 = arith.addf %131, %133 : vector<8x128xf32>
      %c2_71 = arith.constant 2 : index
      %c0_72 = arith.constant 0 : index
      %135 = memref.load %arg5[%c2_71, %c0_72] : memref<9x2xf32, #tpu.memory_space<smem>>
      %cst_73 = arith.constant 1.500000e+01 : f32
      %136 = arith.mulf %135, %cst_73 : f32
      %c2_74 = arith.constant 2 : index
      %c1_75 = arith.constant 1 : index
      %137 = memref.load %arg5[%c2_74, %c1_75] : memref<9x2xf32, #tpu.memory_space<smem>>
      %cst_76 = arith.constant 1.270000e+02 : f32
      %138 = arith.mulf %137, %cst_76 : f32
      %c2_77 = arith.constant 2 : index
      %139 = memref.load %arg3[%c2_77] : memref<9xf32, #tpu.memory_space<smem>>
      %cst_78 = arith.constant 2.000000e+00 : f32
      %140 = arith.mulf %139, %cst_78 : f32
      %c2_79 = arith.constant 2 : index
      %141 = memref.load %arg4[%c2_79] : memref<9xf32, #tpu.memory_space<smem>>
      %cst_80 = arith.constant 2.500000e+01 : f32
      %142 = arith.mulf %141, %cst_80 : f32
      %c2_81 = arith.constant 2 : index
      %143 = memref.load %arg2[%c2_81] : memref<9xf32, #tpu.memory_space<smem>>
      %cst_82 = arith.constant 3.000000e-01 : f32
      %144 = arith.mulf %143, %cst_82 : f32
      %145 = arith.mulf %142, %142 : f32
      %cst_83 = arith.constant 1.000000e+00 : f32
      %146 = arith.divf %cst_83, %145 : f32
      %147 = vector.broadcast %136 : f32 to vector<8x1xf32>
      %148 = arith.subf %16, %147 : vector<8x1xf32>
      %149 = arith.mulf %148, %148 : vector<8x1xf32>
      %150 = vector.broadcast %138 : f32 to vector<1x128xf32>
      %151 = arith.subf %18, %150 : vector<1x128xf32>
      %152 = arith.mulf %151, %151 : vector<1x128xf32>
      %153 = vector.broadcast %149 : vector<8x1xf32> to vector<8x128xf32>
      %154 = vector.broadcast %152 : vector<1x128xf32> to vector<8x128xf32>
      %155 = arith.addf %153, %154 : vector<8x128xf32>
      %156 = vector.broadcast %146 : f32 to vector<8x128xf32>
      %157 = arith.mulf %155, %156 : vector<8x128xf32>
      %158 = vector.broadcast %140 : f32 to vector<8x128xf32>
      %159 = math.powf %157, %158 : vector<8x128xf32>
      %cst_84 = arith.constant 0.000000e+00 : f32
      %160 = vector.broadcast %cst_84 : f32 to vector<8x128xf32>
      %161 = arith.subf %160, %159 : vector<8x128xf32>
      %cst_85 = arith.constant 1.000000e-10 : f32
      %162 = vector.broadcast %cst_85 : f32 to vector<8x128xf32>
      %163 = arith.addf %161, %162 : vector<8x128xf32>
      %164 = math.exp %163 : vector<8x128xf32>
      %165 = vector.broadcast %144 : f32 to vector<8x128xf32>
      %166 = arith.mulf %165, %164 : vector<8x128xf32>
      %cst_86 = arith.constant 1.000000e+00 : f32
      %167 = vector.broadcast %cst_86 : f32 to vector<8x128xf32>
      %168 = arith.subf %167, %166 : vector<8x128xf32>
      %169 = arith.mulf %113, %168 : vector<8x128xf32>
      %c2_87 = arith.constant 2 : index
      %c0_88 = arith.constant 0 : index
      %170 = memref.load %arg6[%c2_87, %c0_88] : memref<9x3xf32, #tpu.memory_space<smem>>
      %cst_89 = arith.constant 4.850000e-01 : f32
      %171 = arith.subf %170, %cst_89 : f32
      %cst_90 = arith.constant 2.290000e-01 : f32
      %172 = arith.divf %171, %cst_90 : f32
      %173 = arith.mulf %168, %120 : vector<8x128xf32>
      %174 = vector.broadcast %172 : f32 to vector<8x128xf32>
      %175 = arith.mulf %166, %174 : vector<8x128xf32>
      %176 = arith.addf %173, %175 : vector<8x128xf32>
      %c2_91 = arith.constant 2 : index
      %c1_92 = arith.constant 1 : index
      %177 = memref.load %arg6[%c2_91, %c1_92] : memref<9x3xf32, #tpu.memory_space<smem>>
      %cst_93 = arith.constant 4.560000e-01 : f32
      %178 = arith.subf %177, %cst_93 : f32
      %cst_94 = arith.constant 2.240000e-01 : f32
      %179 = arith.divf %178, %cst_94 : f32
      %180 = arith.mulf %168, %127 : vector<8x128xf32>
      %181 = vector.broadcast %179 : f32 to vector<8x128xf32>
      %182 = arith.mulf %166, %181 : vector<8x128xf32>
      %183 = arith.addf %180, %182 : vector<8x128xf32>
      %c2_95 = arith.constant 2 : index
      %c2_96 = arith.constant 2 : index
      %184 = memref.load %arg6[%c2_95, %c2_96] : memref<9x3xf32, #tpu.memory_space<smem>>
      %cst_97 = arith.constant 4.060000e-01 : f32
      %185 = arith.subf %184, %cst_97 : f32
      %cst_98 = arith.constant 2.250000e-01 : f32
      %186 = arith.divf %185, %cst_98 : f32
      %187 = arith.mulf %168, %134 : vector<8x128xf32>
      %188 = vector.broadcast %186 : f32 to vector<8x128xf32>
      %189 = arith.mulf %166, %188 : vector<8x128xf32>
      %190 = arith.addf %187, %189 : vector<8x128xf32>
      %c3 = arith.constant 3 : index
      %c0_99 = arith.constant 0 : index
      %191 = memref.load %arg5[%c3, %c0_99] : memref<9x2xf32, #tpu.memory_space<smem>>
      %cst_100 = arith.constant 1.500000e+01 : f32
      %192 = arith.mulf %191, %cst_100 : f32
      %c3_101 = arith.constant 3 : index
      %c1_102 = arith.constant 1 : index
      %193 = memref.load %arg5[%c3_101, %c1_102] : memref<9x2xf32, #tpu.memory_space<smem>>
      %cst_103 = arith.constant 1.270000e+02 : f32
      %194 = arith.mulf %193, %cst_103 : f32
      %c3_104 = arith.constant 3 : index
      %195 = memref.load %arg3[%c3_104] : memref<9xf32, #tpu.memory_space<smem>>
      %cst_105 = arith.constant 2.000000e+00 : f32
      %196 = arith.mulf %195, %cst_105 : f32
      %c3_106 = arith.constant 3 : index
      %197 = memref.load %arg4[%c3_106] : memref<9xf32, #tpu.memory_space<smem>>
      %cst_107 = arith.constant 2.500000e+01 : f32
      %198 = arith.mulf %197, %cst_107 : f32
      %c3_108 = arith.constant 3 : index
      %199 = memref.load %arg2[%c3_108] : memref<9xf32, #tpu.memory_space<smem>>
      %cst_109 = arith.constant 3.000000e-01 : f32
      %200 = arith.mulf %199, %cst_109 : f32
      %201 = arith.mulf %198, %198 : f32
      %cst_110 = arith.constant 1.000000e+00 : f32
      %202 = arith.divf %cst_110, %201 : f32
      %203 = vector.broadcast %192 : f32 to vector<8x1xf32>
      %204 = arith.subf %16, %203 : vector<8x1xf32>
      %205 = arith.mulf %204, %204 : vector<8x1xf32>
      %206 = vector.broadcast %194 : f32 to vector<1x128xf32>
      %207 = arith.subf %18, %206 : vector<1x128xf32>
      %208 = arith.mulf %207, %207 : vector<1x128xf32>
      %209 = vector.broadcast %205 : vector<8x1xf32> to vector<8x128xf32>
      %210 = vector.broadcast %208 : vector<1x128xf32> to vector<8x128xf32>
      %211 = arith.addf %209, %210 : vector<8x128xf32>
      %212 = vector.broadcast %202 : f32 to vector<8x128xf32>
      %213 = arith.mulf %211, %212 : vector<8x128xf32>
      %214 = vector.broadcast %196 : f32 to vector<8x128xf32>
      %215 = math.powf %213, %214 : vector<8x128xf32>
      %cst_111 = arith.constant 0.000000e+00 : f32
      %216 = vector.broadcast %cst_111 : f32 to vector<8x128xf32>
      %217 = arith.subf %216, %215 : vector<8x128xf32>
      %cst_112 = arith.constant 1.000000e-10 : f32
      %218 = vector.broadcast %cst_112 : f32 to vector<8x128xf32>
      %219 = arith.addf %217, %218 : vector<8x128xf32>
      %220 = math.exp %219 : vector<8x128xf32>
      %221 = vector.broadcast %200 : f32 to vector<8x128xf32>
      %222 = arith.mulf %221, %220 : vector<8x128xf32>
      %cst_113 = arith.constant 1.000000e+00 : f32
      %223 = vector.broadcast %cst_113 : f32 to vector<8x128xf32>
      %224 = arith.subf %223, %222 : vector<8x128xf32>
      %225 = arith.mulf %169, %224 : vector<8x128xf32>
      %c3_114 = arith.constant 3 : index
      %c0_115 = arith.constant 0 : index
      %226 = memref.load %arg6[%c3_114, %c0_115] : memref<9x3xf32, #tpu.memory_space<smem>>
      %cst_116 = arith.constant 4.850000e-01 : f32
      %227 = arith.subf %226, %cst_116 : f32
      %cst_117 = arith.constant 2.290000e-01 : f32
      %228 = arith.divf %227, %cst_117 : f32
      %229 = arith.mulf %224, %176 : vector<8x128xf32>
      %230 = vector.broadcast %228 : f32 to vector<8x128xf32>
      %231 = arith.mulf %222, %230 : vector<8x128xf32>
      %232 = arith.addf %229, %231 : vector<8x128xf32>
      %c3_118 = arith.constant 3 : index
      %c1_119 = arith.constant 1 : index
      %233 = memref.load %arg6[%c3_118, %c1_119] : memref<9x3xf32, #tpu.memory_space<smem>>
      %cst_120 = arith.constant 4.560000e-01 : f32
      %234 = arith.subf %233, %cst_120 : f32
      %cst_121 = arith.constant 2.240000e-01 : f32
      %235 = arith.divf %234, %cst_121 : f32
      %236 = arith.mulf %224, %183 : vector<8x128xf32>
      %237 = vector.broadcast %235 : f32 to vector<8x128xf32>
      %238 = arith.mulf %222, %237 : vector<8x128xf32>
      %239 = arith.addf %236, %238 : vector<8x128xf32>
      %c3_122 = arith.constant 3 : index
      %c2_123 = arith.constant 2 : index
      %240 = memref.load %arg6[%c3_122, %c2_123] : memref<9x3xf32, #tpu.memory_space<smem>>
      %cst_124 = arith.constant 4.060000e-01 : f32
      %241 = arith.subf %240, %cst_124 : f32
      %cst_125 = arith.constant 2.250000e-01 : f32
      %242 = arith.divf %241, %cst_125 : f32
      %243 = arith.mulf %224, %190 : vector<8x128xf32>
      %244 = vector.broadcast %242 : f32 to vector<8x128xf32>
      %245 = arith.mulf %222, %244 : vector<8x128xf32>
      %246 = arith.addf %243, %245 : vector<8x128xf32>
      %c4 = arith.constant 4 : index
      %c0_126 = arith.constant 0 : index
      %247 = memref.load %arg5[%c4, %c0_126] : memref<9x2xf32, #tpu.memory_space<smem>>
      %cst_127 = arith.constant 1.500000e+01 : f32
      %248 = arith.mulf %247, %cst_127 : f32
      %c4_128 = arith.constant 4 : index
      %c1_129 = arith.constant 1 : index
      %249 = memref.load %arg5[%c4_128, %c1_129] : memref<9x2xf32, #tpu.memory_space<smem>>
      %cst_130 = arith.constant 1.270000e+02 : f32
      %250 = arith.mulf %249, %cst_130 : f32
      %c4_131 = arith.constant 4 : index
      %251 = memref.load %arg3[%c4_131] : memref<9xf32, #tpu.memory_space<smem>>
      %cst_132 = arith.constant 2.000000e+00 : f32
      %252 = arith.mulf %251, %cst_132 : f32
      %c4_133 = arith.constant 4 : index
      %253 = memref.load %arg4[%c4_133] : memref<9xf32, #tpu.memory_space<smem>>
      %cst_134 = arith.constant 2.500000e+01 : f32
      %254 = arith.mulf %253, %cst_134 : f32
      %c4_135 = arith.constant 4 : index
      %255 = memref.load %arg2[%c4_135] : memref<9xf32, #tpu.memory_space<smem>>
      %cst_136 = arith.constant 3.000000e-01 : f32
      %256 = arith.mulf %255, %cst_136 : f32
      %257 = arith.mulf %254, %254 : f32
      %cst_137 = arith.constant 1.000000e+00 : f32
      %258 = arith.divf %cst_137, %257 : f32
      %259 = vector.broadcast %248 : f32 to vector<8x1xf32>
      %260 = arith.subf %16, %259 : vector<8x1xf32>
      %261 = arith.mulf %260, %260 : vector<8x1xf32>
      %262 = vector.broadcast %250 : f32 to vector<1x128xf32>
      %263 = arith.subf %18, %262 : vector<1x128xf32>
      %264 = arith.mulf %263, %263 : vector<1x128xf32>
      %265 = vector.broadcast %261 : vector<8x1xf32> to vector<8x128xf32>
      %266 = vector.broadcast %264 : vector<1x128xf32> to vector<8x128xf32>
      %267 = arith.addf %265, %266 : vector<8x128xf32>
      %268 = vector.broadcast %258 : f32 to vector<8x128xf32>
      %269 = arith.mulf %267, %268 : vector<8x128xf32>
      %270 = vector.broadcast %252 : f32 to vector<8x128xf32>
      %271 = math.powf %269, %270 : vector<8x128xf32>
      %cst_138 = arith.constant 0.000000e+00 : f32
      %272 = vector.broadcast %cst_138 : f32 to vector<8x128xf32>
      %273 = arith.subf %272, %271 : vector<8x128xf32>
      %cst_139 = arith.constant 1.000000e-10 : f32
      %274 = vector.broadcast %cst_139 : f32 to vector<8x128xf32>
      %275 = arith.addf %273, %274 : vector<8x128xf32>
      %276 = math.exp %275 : vector<8x128xf32>
      %277 = vector.broadcast %256 : f32 to vector<8x128xf32>
      %278 = arith.mulf %277, %276 : vector<8x128xf32>
      %cst_140 = arith.constant 1.000000e+00 : f32
      %279 = vector.broadcast %cst_140 : f32 to vector<8x128xf32>
      %280 = arith.subf %279, %278 : vector<8x128xf32>
      %281 = arith.mulf %225, %280 : vector<8x128xf32>
      %c4_141 = arith.constant 4 : index
      %c0_142 = arith.constant 0 : index
      %282 = memref.load %arg6[%c4_141, %c0_142] : memref<9x3xf32, #tpu.memory_space<smem>>
      %cst_143 = arith.constant 4.850000e-01 : f32
      %283 = arith.subf %282, %cst_143 : f32
      %cst_144 = arith.constant 2.290000e-01 : f32
      %284 = arith.divf %283, %cst_144 : f32
      %285 = arith.mulf %280, %232 : vector<8x128xf32>
      %286 = vector.broadcast %284 : f32 to vector<8x128xf32>
      %287 = arith.mulf %278, %286 : vector<8x128xf32>
      %288 = arith.addf %285, %287 : vector<8x128xf32>
      %c4_145 = arith.constant 4 : index
      %c1_146 = arith.constant 1 : index
      %289 = memref.load %arg6[%c4_145, %c1_146] : memref<9x3xf32, #tpu.memory_space<smem>>
      %cst_147 = arith.constant 4.560000e-01 : f32
      %290 = arith.subf %289, %cst_147 : f32
      %cst_148 = arith.constant 2.240000e-01 : f32
      %291 = arith.divf %290, %cst_148 : f32
      %292 = arith.mulf %280, %239 : vector<8x128xf32>
      %293 = vector.broadcast %291 : f32 to vector<8x128xf32>
      %294 = arith.mulf %278, %293 : vector<8x128xf32>
      %295 = arith.addf %292, %294 : vector<8x128xf32>
      %c4_149 = arith.constant 4 : index
      %c2_150 = arith.constant 2 : index
      %296 = memref.load %arg6[%c4_149, %c2_150] : memref<9x3xf32, #tpu.memory_space<smem>>
      %cst_151 = arith.constant 4.060000e-01 : f32
      %297 = arith.subf %296, %cst_151 : f32
      %cst_152 = arith.constant 2.250000e-01 : f32
      %298 = arith.divf %297, %cst_152 : f32
      %299 = arith.mulf %280, %246 : vector<8x128xf32>
      %300 = vector.broadcast %298 : f32 to vector<8x128xf32>
      %301 = arith.mulf %278, %300 : vector<8x128xf32>
      %302 = arith.addf %299, %301 : vector<8x128xf32>
      %c5 = arith.constant 5 : index
      %c0_153 = arith.constant 0 : index
      %303 = memref.load %arg5[%c5, %c0_153] : memref<9x2xf32, #tpu.memory_space<smem>>
      %cst_154 = arith.constant 1.500000e+01 : f32
      %304 = arith.mulf %303, %cst_154 : f32
      %c5_155 = arith.constant 5 : index
      %c1_156 = arith.constant 1 : index
      %305 = memref.load %arg5[%c5_155, %c1_156] : memref<9x2xf32, #tpu.memory_space<smem>>
      %cst_157 = arith.constant 1.270000e+02 : f32
      %306 = arith.mulf %305, %cst_157 : f32
      %c5_158 = arith.constant 5 : index
      %307 = memref.load %arg3[%c5_158] : memref<9xf32, #tpu.memory_space<smem>>
      %cst_159 = arith.constant 2.000000e+00 : f32
      %308 = arith.mulf %307, %cst_159 : f32
      %c5_160 = arith.constant 5 : index
      %309 = memref.load %arg4[%c5_160] : memref<9xf32, #tpu.memory_space<smem>>
      %cst_161 = arith.constant 2.500000e+01 : f32
      %310 = arith.mulf %309, %cst_161 : f32
      %c5_162 = arith.constant 5 : index
      %311 = memref.load %arg2[%c5_162] : memref<9xf32, #tpu.memory_space<smem>>
      %cst_163 = arith.constant 3.000000e-01 : f32
      %312 = arith.mulf %311, %cst_163 : f32
      %313 = arith.mulf %310, %310 : f32
      %cst_164 = arith.constant 1.000000e+00 : f32
      %314 = arith.divf %cst_164, %313 : f32
      %315 = vector.broadcast %304 : f32 to vector<8x1xf32>
      %316 = arith.subf %16, %315 : vector<8x1xf32>
      %317 = arith.mulf %316, %316 : vector<8x1xf32>
      %318 = vector.broadcast %306 : f32 to vector<1x128xf32>
      %319 = arith.subf %18, %318 : vector<1x128xf32>
      %320 = arith.mulf %319, %319 : vector<1x128xf32>
      %321 = vector.broadcast %317 : vector<8x1xf32> to vector<8x128xf32>
      %322 = vector.broadcast %320 : vector<1x128xf32> to vector<8x128xf32>
      %323 = arith.addf %321, %322 : vector<8x128xf32>
      %324 = vector.broadcast %314 : f32 to vector<8x128xf32>
      %325 = arith.mulf %323, %324 : vector<8x128xf32>
      %326 = vector.broadcast %308 : f32 to vector<8x128xf32>
      %327 = math.powf %325, %326 : vector<8x128xf32>
      %cst_165 = arith.constant 0.000000e+00 : f32
      %328 = vector.broadcast %cst_165 : f32 to vector<8x128xf32>
      %329 = arith.subf %328, %327 : vector<8x128xf32>
      %cst_166 = arith.constant 1.000000e-10 : f32
      %330 = vector.broadcast %cst_166 : f32 to vector<8x128xf32>
      %331 = arith.addf %329, %330 : vector<8x128xf32>
      %332 = math.exp %331 : vector<8x128xf32>
      %333 = vector.broadcast %312 : f32 to vector<8x128xf32>
      %334 = arith.mulf %333, %332 : vector<8x128xf32>
      %cst_167 = arith.constant 1.000000e+00 : f32
      %335 = vector.broadcast %cst_167 : f32 to vector<8x128xf32>
      %336 = arith.subf %335, %334 : vector<8x128xf32>
      %337 = arith.mulf %281, %336 : vector<8x128xf32>
      %c5_168 = arith.constant 5 : index
      %c0_169 = arith.constant 0 : index
      %338 = memref.load %arg6[%c5_168, %c0_169] : memref<9x3xf32, #tpu.memory_space<smem>>
      %cst_170 = arith.constant 4.850000e-01 : f32
      %339 = arith.subf %338, %cst_170 : f32
      %cst_171 = arith.constant 2.290000e-01 : f32
      %340 = arith.divf %339, %cst_171 : f32
      %341 = arith.mulf %336, %288 : vector<8x128xf32>
      %342 = vector.broadcast %340 : f32 to vector<8x128xf32>
      %343 = arith.mulf %334, %342 : vector<8x128xf32>
      %344 = arith.addf %341, %343 : vector<8x128xf32>
      %c5_172 = arith.constant 5 : index
      %c1_173 = arith.constant 1 : index
      %345 = memref.load %arg6[%c5_172, %c1_173] : memref<9x3xf32, #tpu.memory_space<smem>>
      %cst_174 = arith.constant 4.560000e-01 : f32
      %346 = arith.subf %345, %cst_174 : f32
      %cst_175 = arith.constant 2.240000e-01 : f32
      %347 = arith.divf %346, %cst_175 : f32
      %348 = arith.mulf %336, %295 : vector<8x128xf32>
      %349 = vector.broadcast %347 : f32 to vector<8x128xf32>
      %350 = arith.mulf %334, %349 : vector<8x128xf32>
      %351 = arith.addf %348, %350 : vector<8x128xf32>
      %c5_176 = arith.constant 5 : index
      %c2_177 = arith.constant 2 : index
      %352 = memref.load %arg6[%c5_176, %c2_177] : memref<9x3xf32, #tpu.memory_space<smem>>
      %cst_178 = arith.constant 4.060000e-01 : f32
      %353 = arith.subf %352, %cst_178 : f32
      %cst_179 = arith.constant 2.250000e-01 : f32
      %354 = arith.divf %353, %cst_179 : f32
      %355 = arith.mulf %336, %302 : vector<8x128xf32>
      %356 = vector.broadcast %354 : f32 to vector<8x128xf32>
      %357 = arith.mulf %334, %356 : vector<8x128xf32>
      %358 = arith.addf %355, %357 : vector<8x128xf32>
      %c6 = arith.constant 6 : index
      %c0_180 = arith.constant 0 : index
      %359 = memref.load %arg5[%c6, %c0_180] : memref<9x2xf32, #tpu.memory_space<smem>>
      %cst_181 = arith.constant 1.500000e+01 : f32
      %360 = arith.mulf %359, %cst_181 : f32
      %c6_182 = arith.constant 6 : index
      %c1_183 = arith.constant 1 : index
      %361 = memref.load %arg5[%c6_182, %c1_183] : memref<9x2xf32, #tpu.memory_space<smem>>
      %cst_184 = arith.constant 1.270000e+02 : f32
      %362 = arith.mulf %361, %cst_184 : f32
      %c6_185 = arith.constant 6 : index
      %363 = memref.load %arg3[%c6_185] : memref<9xf32, #tpu.memory_space<smem>>
      %cst_186 = arith.constant 2.000000e+00 : f32
      %364 = arith.mulf %363, %cst_186 : f32
      %c6_187 = arith.constant 6 : index
      %365 = memref.load %arg4[%c6_187] : memref<9xf32, #tpu.memory_space<smem>>
      %cst_188 = arith.constant 2.500000e+01 : f32
      %366 = arith.mulf %365, %cst_188 : f32
      %c6_189 = arith.constant 6 : index
      %367 = memref.load %arg2[%c6_189] : memref<9xf32, #tpu.memory_space<smem>>
      %cst_190 = arith.constant 3.000000e-01 : f32
      %368 = arith.mulf %367, %cst_190 : f32
      %369 = arith.mulf %366, %366 : f32
      %cst_191 = arith.constant 1.000000e+00 : f32
      %370 = arith.divf %cst_191, %369 : f32
      %371 = vector.broadcast %360 : f32 to vector<8x1xf32>
      %372 = arith.subf %16, %371 : vector<8x1xf32>
      %373 = arith.mulf %372, %372 : vector<8x1xf32>
      %374 = vector.broadcast %362 : f32 to vector<1x128xf32>
      %375 = arith.subf %18, %374 : vector<1x128xf32>
      %376 = arith.mulf %375, %375 : vector<1x128xf32>
      %377 = vector.broadcast %373 : vector<8x1xf32> to vector<8x128xf32>
      %378 = vector.broadcast %376 : vector<1x128xf32> to vector<8x128xf32>
      %379 = arith.addf %377, %378 : vector<8x128xf32>
      %380 = vector.broadcast %370 : f32 to vector<8x128xf32>
      %381 = arith.mulf %379, %380 : vector<8x128xf32>
      %382 = vector.broadcast %364 : f32 to vector<8x128xf32>
      %383 = math.powf %381, %382 : vector<8x128xf32>
      %cst_192 = arith.constant 0.000000e+00 : f32
      %384 = vector.broadcast %cst_192 : f32 to vector<8x128xf32>
      %385 = arith.subf %384, %383 : vector<8x128xf32>
      %cst_193 = arith.constant 1.000000e-10 : f32
      %386 = vector.broadcast %cst_193 : f32 to vector<8x128xf32>
      %387 = arith.addf %385, %386 : vector<8x128xf32>
      %388 = math.exp %387 : vector<8x128xf32>
      %389 = vector.broadcast %368 : f32 to vector<8x128xf32>
      %390 = arith.mulf %389, %388 : vector<8x128xf32>
      %cst_194 = arith.constant 1.000000e+00 : f32
      %391 = vector.broadcast %cst_194 : f32 to vector<8x128xf32>
      %392 = arith.subf %391, %390 : vector<8x128xf32>
      %393 = arith.mulf %337, %392 : vector<8x128xf32>
      %c6_195 = arith.constant 6 : index
      %c0_196 = arith.constant 0 : index
      %394 = memref.load %arg6[%c6_195, %c0_196] : memref<9x3xf32, #tpu.memory_space<smem>>
      %cst_197 = arith.constant 4.850000e-01 : f32
      %395 = arith.subf %394, %cst_197 : f32
      %cst_198 = arith.constant 2.290000e-01 : f32
      %396 = arith.divf %395, %cst_198 : f32
      %397 = arith.mulf %392, %344 : vector<8x128xf32>
      %398 = vector.broadcast %396 : f32 to vector<8x128xf32>
      %399 = arith.mulf %390, %398 : vector<8x128xf32>
      %400 = arith.addf %397, %399 : vector<8x128xf32>
      %c6_199 = arith.constant 6 : index
      %c1_200 = arith.constant 1 : index
      %401 = memref.load %arg6[%c6_199, %c1_200] : memref<9x3xf32, #tpu.memory_space<smem>>
      %cst_201 = arith.constant 4.560000e-01 : f32
      %402 = arith.subf %401, %cst_201 : f32
      %cst_202 = arith.constant 2.240000e-01 : f32
      %403 = arith.divf %402, %cst_202 : f32
      %404 = arith.mulf %392, %351 : vector<8x128xf32>
      %405 = vector.broadcast %403 : f32 to vector<8x128xf32>
      %406 = arith.mulf %390, %405 : vector<8x128xf32>
      %407 = arith.addf %404, %406 : vector<8x128xf32>
      %c6_203 = arith.constant 6 : index
      %c2_204 = arith.constant 2 : index
      %408 = memref.load %arg6[%c6_203, %c2_204] : memref<9x3xf32, #tpu.memory_space<smem>>
      %cst_205 = arith.constant 4.060000e-01 : f32
      %409 = arith.subf %408, %cst_205 : f32
      %cst_206 = arith.constant 2.250000e-01 : f32
      %410 = arith.divf %409, %cst_206 : f32
      %411 = arith.mulf %392, %358 : vector<8x128xf32>
      %412 = vector.broadcast %410 : f32 to vector<8x128xf32>
      %413 = arith.mulf %390, %412 : vector<8x128xf32>
      %414 = arith.addf %411, %413 : vector<8x128xf32>
      %c7 = arith.constant 7 : index
      %c0_207 = arith.constant 0 : index
      %415 = memref.load %arg5[%c7, %c0_207] : memref<9x2xf32, #tpu.memory_space<smem>>
      %cst_208 = arith.constant 1.500000e+01 : f32
      %416 = arith.mulf %415, %cst_208 : f32
      %c7_209 = arith.constant 7 : index
      %c1_210 = arith.constant 1 : index
      %417 = memref.load %arg5[%c7_209, %c1_210] : memref<9x2xf32, #tpu.memory_space<smem>>
      %cst_211 = arith.constant 1.270000e+02 : f32
      %418 = arith.mulf %417, %cst_211 : f32
      %c7_212 = arith.constant 7 : index
      %419 = memref.load %arg3[%c7_212] : memref<9xf32, #tpu.memory_space<smem>>
      %cst_213 = arith.constant 2.000000e+00 : f32
      %420 = arith.mulf %419, %cst_213 : f32
      %c7_214 = arith.constant 7 : index
      %421 = memref.load %arg4[%c7_214] : memref<9xf32, #tpu.memory_space<smem>>
      %cst_215 = arith.constant 2.500000e+01 : f32
      %422 = arith.mulf %421, %cst_215 : f32
      %c7_216 = arith.constant 7 : index
      %423 = memref.load %arg2[%c7_216] : memref<9xf32, #tpu.memory_space<smem>>
      %cst_217 = arith.constant 3.000000e-01 : f32
      %424 = arith.mulf %423, %cst_217 : f32
      %425 = arith.mulf %422, %422 : f32
      %cst_218 = arith.constant 1.000000e+00 : f32
      %426 = arith.divf %cst_218, %425 : f32
      %427 = vector.broadcast %416 : f32 to vector<8x1xf32>
      %428 = arith.subf %16, %427 : vector<8x1xf32>
      %429 = arith.mulf %428, %428 : vector<8x1xf32>
      %430 = vector.broadcast %418 : f32 to vector<1x128xf32>
      %431 = arith.subf %18, %430 : vector<1x128xf32>
      %432 = arith.mulf %431, %431 : vector<1x128xf32>
      %433 = vector.broadcast %429 : vector<8x1xf32> to vector<8x128xf32>
      %434 = vector.broadcast %432 : vector<1x128xf32> to vector<8x128xf32>
      %435 = arith.addf %433, %434 : vector<8x128xf32>
      %436 = vector.broadcast %426 : f32 to vector<8x128xf32>
      %437 = arith.mulf %435, %436 : vector<8x128xf32>
      %438 = vector.broadcast %420 : f32 to vector<8x128xf32>
      %439 = math.powf %437, %438 : vector<8x128xf32>
      %cst_219 = arith.constant 0.000000e+00 : f32
      %440 = vector.broadcast %cst_219 : f32 to vector<8x128xf32>
      %441 = arith.subf %440, %439 : vector<8x128xf32>
      %cst_220 = arith.constant 1.000000e-10 : f32
      %442 = vector.broadcast %cst_220 : f32 to vector<8x128xf32>
      %443 = arith.addf %441, %442 : vector<8x128xf32>
      %444 = math.exp %443 : vector<8x128xf32>
      %445 = vector.broadcast %424 : f32 to vector<8x128xf32>
      %446 = arith.mulf %445, %444 : vector<8x128xf32>
      %cst_221 = arith.constant 1.000000e+00 : f32
      %447 = vector.broadcast %cst_221 : f32 to vector<8x128xf32>
      %448 = arith.subf %447, %446 : vector<8x128xf32>
      %449 = arith.mulf %393, %448 : vector<8x128xf32>
      %c7_222 = arith.constant 7 : index
      %c0_223 = arith.constant 0 : index
      %450 = memref.load %arg6[%c7_222, %c0_223] : memref<9x3xf32, #tpu.memory_space<smem>>
      %cst_224 = arith.constant 4.850000e-01 : f32
      %451 = arith.subf %450, %cst_224 : f32
      %cst_225 = arith.constant 2.290000e-01 : f32
      %452 = arith.divf %451, %cst_225 : f32
      %453 = arith.mulf %448, %400 : vector<8x128xf32>
      %454 = vector.broadcast %452 : f32 to vector<8x128xf32>
      %455 = arith.mulf %446, %454 : vector<8x128xf32>
      %456 = arith.addf %453, %455 : vector<8x128xf32>
      %c7_226 = arith.constant 7 : index
      %c1_227 = arith.constant 1 : index
      %457 = memref.load %arg6[%c7_226, %c1_227] : memref<9x3xf32, #tpu.memory_space<smem>>
      %cst_228 = arith.constant 4.560000e-01 : f32
      %458 = arith.subf %457, %cst_228 : f32
      %cst_229 = arith.constant 2.240000e-01 : f32
      %459 = arith.divf %458, %cst_229 : f32
      %460 = arith.mulf %448, %407 : vector<8x128xf32>
      %461 = vector.broadcast %459 : f32 to vector<8x128xf32>
      %462 = arith.mulf %446, %461 : vector<8x128xf32>
      %463 = arith.addf %460, %462 : vector<8x128xf32>
      %c7_230 = arith.constant 7 : index
      %c2_231 = arith.constant 2 : index
      %464 = memref.load %arg6[%c7_230, %c2_231] : memref<9x3xf32, #tpu.memory_space<smem>>
      %cst_232 = arith.constant 4.060000e-01 : f32
      %465 = arith.subf %464, %cst_232 : f32
      %cst_233 = arith.constant 2.250000e-01 : f32
      %466 = arith.divf %465, %cst_233 : f32
      %467 = arith.mulf %448, %414 : vector<8x128xf32>
      %468 = vector.broadcast %466 : f32 to vector<8x128xf32>
      %469 = arith.mulf %446, %468 : vector<8x128xf32>
      %470 = arith.addf %467, %469 : vector<8x128xf32>
      %c8 = arith.constant 8 : index
      %c0_234 = arith.constant 0 : index
      %471 = memref.load %arg5[%c8, %c0_234] : memref<9x2xf32, #tpu.memory_space<smem>>
      %cst_235 = arith.constant 1.500000e+01 : f32
      %472 = arith.mulf %471, %cst_235 : f32
      %c8_236 = arith.constant 8 : index
      %c1_237 = arith.constant 1 : index
      %473 = memref.load %arg5[%c8_236, %c1_237] : memref<9x2xf32, #tpu.memory_space<smem>>
      %cst_238 = arith.constant 1.270000e+02 : f32
      %474 = arith.mulf %473, %cst_238 : f32
      %c8_239 = arith.constant 8 : index
      %475 = memref.load %arg3[%c8_239] : memref<9xf32, #tpu.memory_space<smem>>
      %cst_240 = arith.constant 2.000000e+00 : f32
      %476 = arith.mulf %475, %cst_240 : f32
      %c8_241 = arith.constant 8 : index
      %477 = memref.load %arg4[%c8_241] : memref<9xf32, #tpu.memory_space<smem>>
      %cst_242 = arith.constant 2.500000e+01 : f32
      %478 = arith.mulf %477, %cst_242 : f32
      %c8_243 = arith.constant 8 : index
      %479 = memref.load %arg2[%c8_243] : memref<9xf32, #tpu.memory_space<smem>>
      %cst_244 = arith.constant 3.000000e-01 : f32
      %480 = arith.mulf %479, %cst_244 : f32
      %481 = arith.mulf %478, %478 : f32
      %cst_245 = arith.constant 1.000000e+00 : f32
      %482 = arith.divf %cst_245, %481 : f32
      %483 = vector.broadcast %472 : f32 to vector<8x1xf32>
      %484 = arith.subf %16, %483 : vector<8x1xf32>
      %485 = arith.mulf %484, %484 : vector<8x1xf32>
      %486 = vector.broadcast %474 : f32 to vector<1x128xf32>
      %487 = arith.subf %18, %486 : vector<1x128xf32>
      %488 = arith.mulf %487, %487 : vector<1x128xf32>
      %489 = vector.broadcast %485 : vector<8x1xf32> to vector<8x128xf32>
      %490 = vector.broadcast %488 : vector<1x128xf32> to vector<8x128xf32>
      %491 = arith.addf %489, %490 : vector<8x128xf32>
      %492 = vector.broadcast %482 : f32 to vector<8x128xf32>
      %493 = arith.mulf %491, %492 : vector<8x128xf32>
      %494 = vector.broadcast %476 : f32 to vector<8x128xf32>
      %495 = math.powf %493, %494 : vector<8x128xf32>
      %cst_246 = arith.constant 0.000000e+00 : f32
      %496 = vector.broadcast %cst_246 : f32 to vector<8x128xf32>
      %497 = arith.subf %496, %495 : vector<8x128xf32>
      %cst_247 = arith.constant 1.000000e-10 : f32
      %498 = vector.broadcast %cst_247 : f32 to vector<8x128xf32>
      %499 = arith.addf %497, %498 : vector<8x128xf32>
      %500 = math.exp %499 : vector<8x128xf32>
      %501 = vector.broadcast %480 : f32 to vector<8x128xf32>
      %502 = arith.mulf %501, %500 : vector<8x128xf32>
      %cst_248 = arith.constant 1.000000e+00 : f32
      %503 = vector.broadcast %cst_248 : f32 to vector<8x128xf32>
      %504 = arith.subf %503, %502 : vector<8x128xf32>
      %505 = arith.mulf %449, %504 : vector<8x128xf32>
      %c8_249 = arith.constant 8 : index
      %c0_250 = arith.constant 0 : index
      %506 = memref.load %arg6[%c8_249, %c0_250] : memref<9x3xf32, #tpu.memory_space<smem>>
      %cst_251 = arith.constant 4.850000e-01 : f32
      %507 = arith.subf %506, %cst_251 : f32
      %cst_252 = arith.constant 2.290000e-01 : f32
      %508 = arith.divf %507, %cst_252 : f32
      %509 = arith.mulf %504, %456 : vector<8x128xf32>
      %510 = vector.broadcast %508 : f32 to vector<8x128xf32>
      %511 = arith.mulf %502, %510 : vector<8x128xf32>
      %512 = arith.addf %509, %511 : vector<8x128xf32>
      %c8_253 = arith.constant 8 : index
      %c1_254 = arith.constant 1 : index
      %513 = memref.load %arg6[%c8_253, %c1_254] : memref<9x3xf32, #tpu.memory_space<smem>>
      %cst_255 = arith.constant 4.560000e-01 : f32
      %514 = arith.subf %513, %cst_255 : f32
      %cst_256 = arith.constant 2.240000e-01 : f32
      %515 = arith.divf %514, %cst_256 : f32
      %516 = arith.mulf %504, %463 : vector<8x128xf32>
      %517 = vector.broadcast %515 : f32 to vector<8x128xf32>
      %518 = arith.mulf %502, %517 : vector<8x128xf32>
      %519 = arith.addf %516, %518 : vector<8x128xf32>
      %c8_257 = arith.constant 8 : index
      %c2_258 = arith.constant 2 : index
      %520 = memref.load %arg6[%c8_257, %c2_258] : memref<9x3xf32, #tpu.memory_space<smem>>
      %cst_259 = arith.constant 4.060000e-01 : f32
      %521 = arith.subf %520, %cst_259 : f32
      %cst_260 = arith.constant 2.250000e-01 : f32
      %522 = arith.divf %521, %cst_260 : f32
      %523 = arith.mulf %504, %470 : vector<8x128xf32>
      %524 = vector.broadcast %522 : f32 to vector<8x128xf32>
      %525 = arith.mulf %502, %524 : vector<8x128xf32>
      %526 = arith.addf %523, %525 : vector<8x128xf32>
      %cst_261 = arith.constant 2.290000e-01 : f32
      %527 = vector.broadcast %cst_261 : f32 to vector<8x128xf32>
      %528 = arith.mulf %505, %527 : vector<8x128xf32>
      %c0_262 = arith.constant 0 : index
      %c0_263 = arith.constant 0 : index
      %c0_264 = arith.constant 0 : index
      %529 = vector.load %arg9[%c0_262, %c0_263, %c0_264] : memref<3x8x128xf32, #tpu.memory_space<vmem>>, vector<1x8x128xf32>
      %530 = vector.shape_cast %529 : vector<1x8x128xf32> to vector<8x128xf32>
      %531 = vector.shape_cast %528 : vector<8x128xf32> to vector<1x8x128xf32>
      tpu.vector_store %arg9[%c0_262, %c0_263, %c0_264], %531 {strides = array<i32>} : memref<3x8x128xf32, #tpu.memory_space<vmem>>, vector<1x8x128xf32>,
      %cst_265 = arith.constant 2.290000e-01 : f32
      %532 = vector.broadcast %cst_265 : f32 to vector<8x128xf32>
      %533 = arith.mulf %512, %532 : vector<8x128xf32>
      %cst_266 = arith.constant 4.850000e-01 : f32
      %534 = vector.broadcast %cst_266 : f32 to vector<8x128xf32>
      %535 = arith.addf %533, %534 : vector<8x128xf32>
      %c0_267 = arith.constant 0 : index
      %c0_268 = arith.constant 0 : index
      %c0_269 = arith.constant 0 : index
      %536 = vector.load %arg10[%c0_267, %c0_268, %c0_269] : memref<3x8x128xf32, #tpu.memory_space<vmem>>, vector<1x8x128xf32>
      %537 = vector.shape_cast %536 : vector<1x8x128xf32> to vector<8x128xf32>
      %538 = vector.shape_cast %535 : vector<8x128xf32> to vector<1x8x128xf32>
      tpu.vector_store %arg10[%c0_267, %c0_268, %c0_269], %538 {strides = array<i32>} : memref<3x8x128xf32, #tpu.memory_space<vmem>>, vector<1x8x128xf32>,
      %cst_270 = arith.constant 2.240000e-01 : f32
      %539 = vector.broadcast %cst_270 : f32 to vector<8x128xf32>
      %540 = arith.mulf %505, %539 : vector<8x128xf32>
      %c1_271 = arith.constant 1 : index
      %c0_272 = arith.constant 0 : index
      %c0_273 = arith.constant 0 : index
      %541 = vector.load %arg9[%c1_271, %c0_272, %c0_273] : memref<3x8x128xf32, #tpu.memory_space<vmem>>, vector<1x8x128xf32>
      %542 = vector.shape_cast %541 : vector<1x8x128xf32> to vector<8x128xf32>
      %543 = vector.shape_cast %540 : vector<8x128xf32> to vector<1x8x128xf32>
      tpu.vector_store %arg9[%c1_271, %c0_272, %c0_273], %543 {strides = array<i32>} : memref<3x8x128xf32, #tpu.memory_space<vmem>>, vector<1x8x128xf32>,
      %cst_274 = arith.constant 2.240000e-01 : f32
      %544 = vector.broadcast %cst_274 : f32 to vector<8x128xf32>
      %545 = arith.mulf %519, %544 : vector<8x128xf32>
      %cst_275 = arith.constant 4.560000e-01 : f32
      %546 = vector.broadcast %cst_275 : f32 to vector<8x128xf32>
      %547 = arith.addf %545, %546 : vector<8x128xf32>
      %c1_276 = arith.constant 1 : index
      %c0_277 = arith.constant 0 : index
      %c0_278 = arith.constant 0 : index
      %548 = vector.load %arg10[%c1_276, %c0_277, %c0_278] : memref<3x8x128xf32, #tpu.memory_space<vmem>>, vector<1x8x128xf32>
      %549 = vector.shape_cast %548 : vector<1x8x128xf32> to vector<8x128xf32>
      %550 = vector.shape_cast %547 : vector<8x128xf32> to vector<1x8x128xf32>
      tpu.vector_store %arg10[%c1_276, %c0_277, %c0_278], %550 {strides = array<i32>} : memref<3x8x128xf32, #tpu.memory_space<vmem>>, vector<1x8x128xf32>,
      %cst_279 = arith.constant 2.250000e-01 : f32
      %551 = vector.broadcast %cst_279 : f32 to vector<8x128xf32>
      %552 = arith.mulf %505, %551 : vector<8x128xf32>
      %c2_280 = arith.constant 2 : index
      %c0_281 = arith.constant 0 : index
      %c0_282 = arith.constant 0 : index
      %553 = vector.load %arg9[%c2_280, %c0_281, %c0_282] : memref<3x8x128xf32, #tpu.memory_space<vmem>>, vector<1x8x128xf32>
      %554 = vector.shape_cast %553 : vector<1x8x128xf32> to vector<8x128xf32>
      %555 = vector.shape_cast %552 : vector<8x128xf32> to vector<1x8x128xf32>
      tpu.vector_store %arg9[%c2_280, %c0_281, %c0_282], %555 {strides = array<i32>} : memref<3x8x128xf32, #tpu.memory_space<vmem>>, vector<1x8x128xf32>,
      %cst_283 = arith.constant 2.250000e-01 : f32
      %556 = vector.broadcast %cst_283 : f32 to vector<8x128xf32>
      %557 = arith.mulf %526, %556 : vector<8x128xf32>
      %cst_284 = arith.constant 4.060000e-01 : f32
      %558 = vector.broadcast %cst_284 : f32 to vector<8x128xf32>
      %559 = arith.addf %557, %558 : vector<8x128xf32>
      %c2_285 = arith.constant 2 : index
      %c0_286 = arith.constant 0 : index
      %c0_287 = arith.constant 0 : index
      %560 = vector.load %arg10[%c2_285, %c0_286, %c0_287] : memref<3x8x128xf32, #tpu.memory_space<vmem>>, vector<1x8x128xf32>
      %561 = vector.shape_cast %560 : vector<1x8x128xf32> to vector<8x128xf32>
      %562 = vector.shape_cast %559 : vector<8x128xf32> to vector<1x8x128xf32>
      tpu.vector_store %arg10[%c2_285, %c0_286, %c0_287], %562 {strides = array<i32>} : memref<3x8x128xf32, #tpu.memory_space<vmem>>, vector<1x8x128xf32>,
    } else {
    }
    %c0 = arith.constant 0 : index
    %c0_1 = arith.constant 0 : index
    %c0_2 = arith.constant 0 : index
    %c0_3 = arith.constant 0 : index
    %4 = vector.load %arg7[%c0, %c0_1, %c0_2, %c0_3] : memref<1x3x8x128xf32, #tpu.memory_space<vmem>>, vector<1x3x8x128xf32>
    %5 = vector.shape_cast %4 : vector<1x3x8x128xf32> to vector<3x8x128xf32>
    %c0_4 = arith.constant 0 : index
    %c0_5 = arith.constant 0 : index
    %c0_6 = arith.constant 0 : index
    %6 = vector.load %arg9[%c0_4, %c0_5, %c0_6] : memref<3x8x128xf32, #tpu.memory_space<vmem>>, vector<3x8x128xf32>
    %7 = arith.mulf %5, %6 : vector<3x8x128xf32>
    %c0_7 = arith.constant 0 : index
    %c0_8 = arith.constant 0 : index
    %c0_9 = arith.constant 0 : index
    %8 = vector.load %arg10[%c0_7, %c0_8, %c0_9] : memref<3x8x128xf32, #tpu.memory_space<vmem>>, vector<3x8x128xf32>
    %9 = arith.addf %7, %8 : vector<3x8x128xf32>
    %c0_10 = arith.constant 0 : index
    %c0_11 = arith.constant 0 : index
    %c0_12 = arith.constant 0 : index
    %c0_13 = arith.constant 0 : index
    %10 = vector.load %arg8[%c0_10, %c0_11, %c0_12, %c0_13] : memref<1x3x8x128xf32, #tpu.memory_space<vmem>>, vector<1x3x8x128xf32>
    %11 = vector.shape_cast %10 : vector<1x3x8x128xf32> to vector<3x8x128xf32>
    %12 = vector.shape_cast %9 : vector<3x8x128xf32> to vector<1x3x8x128xf32>
    tpu.vector_store %arg8[%c0_10, %c0_11, %c0_12, %c0_13], %12 {strides = array<i32>} : memref<1x3x8x128xf32, #tpu.memory_space<vmem>>, vector<1x3x8x128xf32>,
    return
  }
  func.func @transform_0(%arg0: i32, %arg1: i32) -> i32 {
    %c0_i32 = arith.constant 0 : i32
    %c0_i32_0 = arith.constant 0 : i32
    return %c0_i32 : i32
  }
  func.func @transform_1(%arg0: i32, %arg1: i32) -> i32 {
    %c0_i32 = arith.constant 0 : i32
    %c0_i32_0 = arith.constant 0 : i32
    return %c0_i32 : i32
  }
  func.func @transform_2(%arg0: i32, %arg1: i32) -> i32 {
    %c0_i32 = arith.constant 0 : i32
    %c0_i32_0 = arith.constant 0 : i32
    return %c0_i32 : i32
  }
  func.func @transform_3(%arg0: i32, %arg1: i32) -> (i32, i32) {
    %c0_i32 = arith.constant 0 : i32
    %c0_i32_0 = arith.constant 0 : i32
    %c0_i32_1 = arith.constant 0 : i32
    return %c0_i32, %c0_i32_0 : i32, i32
  }
  func.func @transform_4(%arg0: i32, %arg1: i32) -> (i32, i32) {
    %c0_i32 = arith.constant 0 : i32
    %c0_i32_0 = arith.constant 0 : i32
    %c0_i32_1 = arith.constant 0 : i32
    return %c0_i32, %c0_i32_0 : i32, i32
  }
  func.func @transform_5(%arg0: i32, %arg1: i32) -> (i32, i32, i32, i32) {
    %c0_i32 = arith.constant 0 : i32
    %c0_i32_0 = arith.constant 0 : i32
    %c0_i32_1 = arith.constant 0 : i32
    return %arg1, %c0_i32, %arg0, %c0_i32_0 : i32, i32, i32, i32
  }
  func.func @transform_6(%arg0: i32, %arg1: i32) -> (i32, i32, i32, i32) {
    %c0_i32 = arith.constant 0 : i32
    %c0_i32_0 = arith.constant 0 : i32
    %c0_i32_1 = arith.constant 0 : i32
    return %arg1, %c0_i32, %arg0, %c0_i32_0 : i32, i32, i32, i32
  }
}

</mosaic_0001>

<bundles_post_ra>
// kernel: tpu_custom_call.1
= control target key start
LH: loop header
LB: loop body
LE: loop exit
PB: predicated region body
PF: predicated region fallthrough
CT: control target
= control target key end

     0   :  { %s4249_s0 = inlined_call_operand.vmem [shape: f32[9], index: 0, kind: input, shape index: {}]   ;;  %s4250_s1 = inlined_call_operand.vmem [shape: f32[9], index: 1, kind: input, shape index: {}]   ;;  %s4251_s2 = inlined_call_operand.vmem [shape: f32[9], index: 2, kind: input, shape index: {}]   ;;  %s4252_s3 = inlined_call_operand.vmem [shape: f32[9,2], index: 3, kind: input, shape index: {}]   ;;  %s4253_s4 = inlined_call_operand.vmem [shape: f32[9,3], index: 4, kind: input, shape index: {}]   ;;  %s4254_s5 = inlined_call_operand.hbm [shape: f32[2,3,16,128], index: 5, kind: input, shape index: {}]   ;;  %s4255_s6 = inlined_call_operand.hbm [shape: f32[2,3,16,128], index: 6, kind: output, shape index: {}]  }
   0x1   :  { %4281 = sst [smem:[#allocation25_spill]] %s4249_s0 }
   0x2   :  { %4282 = sst [smem:[#allocation26_spill]] %s4250_s1 }
   0x3   :  { %4283 = sst [smem:[#allocation27_spill]] %s4251_s2 }
   0x4   :  { %4284 = sst [smem:[#allocation28_spill]] %s4252_s3 }
   0x5   :  { %4285 = sst [smem:[#allocation29_spill]] %s4253_s4 }
   0x6   :  { %4286 = sst [smem:[#allocation30_spill]] %s4254_s5 }
   0x7   :  { %11 = vsyncpa [#allocation7], 0 }
   0x8   :  { %12 = vsyncpa [#allocation9], 0 }
   0x9   :  { %13 = vsyncpa [#allocation12], 0 }
   0xa   :  { %14 = vsyncpa [#allocation5], 0 }
   0xb   :  { %16 = vsyncpa [#allocation5 + $0x1], 0 }
   0xc   :  { %17 = vsyncpa [#allocation6], 0 }
   0xd   :  { %19 = vsyncpa [#allocation6 + $0x1], 0  ;;  %s2176_s21 = smov 0   ;;  %s2178_s22 = smov 0  }
   0xe   :  { %s2180_s23 = smov 0   ;;  %s2182_s24 = smov 0  }
   0xf   :  { %s2184_s25 = smov 0   ;;  %s2186_s26 = smov 0  }
  0x10   :  { %s2188_s27 = smov 0   ;;  %s2190_s28 = smov 0  }
  0x11 LB: > { %4287 = sst [smem:[#allocation21_spill]] %s2120_s27  ;;  %s1095_s29 = sadd.s32 4294967295, %s2124_s28   ;;  %s2124_s28 = sphi %s2190_s28, %s25_s28   ;;  %s2120_s27 = sphi %s2188_s27, %s4588_s27   ;;  %s2116_s26 = sphi %s2186_s26, %s4593_s26   ;;  %s2112_s25 = sphi %s2184_s25, %s4586_s25   ;;  %s2108_s24 = sphi %s2182_s24, %s4592_s24   ;;  %s2104_s23 = sphi %s2180_s23, %s4591_s23   ;;  %s2100_s22 = sphi %s2178_s22, %s4590_s22   ;;  %s2096_s21 = sphi %s2176_s21, %s4589_s21  }
  0x12   : > { %s1096_s30 = sadd.s32 4294967294, %s2124_s28   ;;  %p164_p0 = scmp.ne.s32.totalorder %s2100_s22, %s2096_s21 }
  0x13   : > { %p2220_p1 = scmp.eq.s32.totalorder %s1095_s29, 0  ;;  %p2224_p2 = scmp.eq.s32.totalorder %s1095_s29, 3 }
  0x14   : > { %p196_p3 = scmp.eq.s32.totalorder %s1096_s30, 3  ;;  %p1097_p5 = scmp.ge.s32.totalorder %s2124_s28, 1 }
  0x15   : > { %s4288_s7 = scalar_select %p2220_p1, 1, 0 }
  0x16   : > { %s4289_s8 = scalar_select %p2224_p2, 1, 0 }
  0x17   : > { %p2230_p4 = por %p2220_p1, %p164_p0  ;;  %p2235_p6 = por %p196_p3, %p164_p0 }
  0x18   : > { %p203_p7 = scmp.lt.s32.totalorder %s2124_s28, 5  ;;  %s4293_s1 = sld [smem:[#allocation26_spill]] }
  0x19   : > { %s4290_s9 = scalar_select %p2230_p4, 1, 0 }
  0x1a   : > { %s4291_s10 = scalar_select %p2235_p6, 1, 0 }
  0x1b   : > { %p2243_p8 = pnand %p1097_p5, %p203_p7  ;;  %s4295_s3 = sld [smem:[#allocation28_spill]] }
  0x1c   : > { %4292 = sst [smem:[#allocation22_spill]] %s4291_s10 }
  0x1d   : > { %s4294_s14 = scalar_select %p2243_p8, 1, 0 }
  0x1e   : > { %s227_s13 = sshll.u32 %s4293_s1, 4  ;;  %p1724_p9 = pneg %p2243_p8  ;;  %s228_s13 = int_to_ptr.vmem [resolvable:$true] %s227_s13 }
  0x1f   : > { %s1909_s19 = scalar_lea.vmem %s228_s13, 16  ;;  %p1917_p3 = scmp.lt.s32.totalorder %s228_s13, %s228_s13 }
  0x20   : > { %p2256_p10 = pnand %p1724_p9, %p2220_p1  ;;  %p1910_p11 = scmp.ne.s32.totalorder %s228_s13, %s1909_s19 }
  0x21   : > { %s248_s17 = sshll.u32 %s4295_s3, 4  ;;  %p1918_p5 = scmp.lt.s32.totalorder %s1909_s19, %s1909_s19  ;;  %s2252_s17 = int_to_ptr.vmem [resolvable:$true] %s248_s17 }
  0x22   : > { %p2262_p12 = pneg %p2256_p10 }
  0x23   : > { %p1919_p7 = por %p1918_p5, %p1917_p3 }
  0x24   : > { %p1912_p13 = pnand %p2262_p12, %p1910_p11 }
  0x26   : > { %p1913_p0 = pneg %p1912_p13 }
  0x28   : > { %p1920_p6 = pnand %p1919_p7, %p1913_p0 }
  0x2a   : > { %1923 = shalt.err (!%p1920_p6)
}
  0x2b   : > { %s2126_s29 = smov [#allocation8]   ;;  %s1924_s30 = scalar_lea.vmem %s2252_s17, 256 }
  0x2c   : > { %1730 = dma.vmem_to_smem (!%p2256_p10), %s228_s13, 16, %s2126_s29, [#allocation9]  }
  0x2d   : > { %p1925_p9 = scmp.ne.s32.totalorder %s2252_s17, %s1924_s30  ;;  %p1932_p11 = scmp.lt.s32.totalorder %s2252_s17, %s2252_s17 }
  0x2e   : > { %p1933_p13 = scmp.lt.s32.totalorder %s1924_s30, %s1924_s30 }
  0x2f   : > { %p1927_p4 = pnand %p1925_p9, %p2262_p12 }
  0x30   : > { %p1934_p8 = por %p1933_p13, %p1932_p11 }
  0x31   : > { %p1928_p1 = pneg %p1927_p4 }
  0x33   : > { %p1935_p3 = pnand %p1934_p8, %p1928_p1 }
  0x35   : > { %1938 = shalt.err (!%p1935_p3)
}
  0x36   : > { %s2127_s11 = smov [#allocation11]   ;;  %s4260_s12 = smov 128  }
  0x37   : > { %s4261_s15 = smov 8   ;;  %s4298_s0 = sld [smem:[#allocation25_spill]] }
  0x38   : > { %1736 = dma.vmem_to_smem (!%p2256_p10), %s2252_s17, 256, %s2127_s11, [#allocation12], %s4260_s12, %s4260_s12, %s4261_s15  }
  0x39   : > { %s4299_s2 = sld [smem:[#allocation27_spill]] }
  0x3d   : > { %s216_s19 = sshll.u32 %s4298_s0, 4  ;;  %s217_s19 = int_to_ptr.vmem [resolvable:$true] %s216_s19 }
  0x3e   : > { %s1939_s3 = scalar_lea.vmem %s217_s19, 16  ;;  %p1947_p8 = scmp.lt.s32.totalorder %s217_s19, %s217_s19 }
  0x3f   : > { %s238_s1 = sshll.u32 %s4299_s2, 4  ;;  %p1940_p1 = scmp.ne.s32.totalorder %s217_s19, %s1939_s3  ;;  %s239_s1 = int_to_ptr.vmem [resolvable:$true] %s238_s1 }
  0x40   : > { %p1948_p0 = scmp.lt.s32.totalorder %s1939_s3, %s1939_s3 }
  0x41   : > { %p1942_p4 = pnand %p1940_p1, %p2262_p12 }
  0x42   : > { %p1949_p5 = por %p1948_p0, %p1947_p8 }
  0x43   : > { %p1943_p6 = pneg %p1942_p4 }
  0x45   : > { %p1950_p7 = pnand %p1949_p5, %p1943_p6 }
  0x47   : > { %1953 = shalt.err (!%p1950_p7)
}
  0x48   : > { %s2130_s17 = smov [#allocation4]   ;;  %s1954_s11 = scalar_lea.vmem %s239_s1, 16 }
  0x49   : > { %1727 = dma.vmem_to_smem (!%p2256_p10), %s217_s19, 16, %s2130_s17, [#allocation7]  }
  0x4a   : > { %p1955_p9 = scmp.ne.s32.totalorder %s239_s1, %s1954_s11  ;;  %p1962_p3 = scmp.lt.s32.totalorder %s239_s1, %s239_s1 }
  0x4b   : > { %p1963_p2 = scmp.lt.s32.totalorder %s1954_s11, %s1954_s11 }
  0x4c   : > { %p1957_p11 = pnand %p1955_p9, %p2262_p12 }
  0x4d   : > { %p1964_p1 = por %p1963_p2, %p1962_p3 }
  0x4e   : > { %p1958_p13 = pneg %p1957_p11 }
  0x50   : > { %p1965_p4 = pnand %p1964_p1, %p1958_p13 }
  0x52   : > { %1968 = shalt.err (!%p1965_p4)
}
  0x53   : > { %s2131_s3 = smov [#allocation10]   ;;  %s4300_s4 = sld [smem:[#allocation29_spill]] }
  0x54   : > { %1733 = dma.vmem_to_smem (!%p2256_p10), %s239_s1, 16, %s2131_s3, [#allocation9]  }
  0x59   : > { %s261_s19 = sshll.u32 %s4300_s4, 4  ;;  %s262_s19 = int_to_ptr.vmem [resolvable:$true] %s261_s19 }
  0x5a   : > { %s1969_s29 = scalar_lea.vmem %s262_s19, 256  ;;  %p1977_p5 = scmp.lt.s32.totalorder %s262_s19, %s262_s19 }
  0x5b   : > { %p1970_p6 = scmp.ne.s32.totalorder %s262_s19, %s1969_s29  ;;  %p1978_p7 = scmp.lt.s32.totalorder %s1969_s29, %s1969_s29 }
  0x5d   : > { %p1972_p8 = pnand %p1970_p6, %p2262_p12  ;;  %p1979_p2 = por %p1978_p7, %p1977_p5 }
  0x5f   : > { %p1973_p0 = pneg %p1972_p8 }
  0x61   : > { %p1980_p9 = pnand %p1979_p2, %p1973_p0 }
  0x63   : > { %1983 = shalt.err (!%p1980_p9)
}
  0x64   : > { %s2132_s30 = smov [#allocation13]   ;;  %s34_s1 = sadd.s32 1, %s2116_s26 }
  0x65   : > { %1739 = dma.vmem_to_smem (!%p2256_p10), %s262_s19, 256, %s2132_s30, [#allocation12], %s4260_s12, %s4260_s12, %s4261_s15  }
  0x66   : > { %p35_p12 = scmp.ge.s32.totalorder %s34_s1, 2  ;;  %s37_s18 = sadd.s32 1, %s2120_s27 }
  0x67   : > { %s151_s20 = sadd.s32 1, %s2104_s23  ;;  %p158_p11 = scmp.ne.s32.totalorder %s2104_s23, %s2100_s22 }
  0x68   : > { %s4595_s1 = smov (%p35_p12, %s34_s1), 0  ;;  %s4597_s18 = smov (!%p35_p12, %s37_s18), %s2120_s27 }
  0x69   : > { %4301 = sst [smem:[#allocation23_spill]] %s4595_s1  ;;  %s146_s17 = ssub.s32 %s2116_s26, %s4595_s1 }
  0x6a   : > { %p159_p13 = scmp.eq.s32.totalorder %s2124_s28, 0  ;;  %p39_p3 = scmp.ge.s32.totalorder %s4597_s18, 2 }
  0x6b   : > { %p4302_p1 = scmp.ne.s32.totalorder %s4289_s8, 0  ;;  %p1753_p6 = scmp.lt.s32.totalorder %s2124_s28, 4 }
  0x6c   : > { %p2323_p10 = por %p159_p13, %p158_p11  ;;  %s4599_s18 = smov (%p39_p3, %s4597_s18), 0 }
  0x6d   : > { %p2319_p4 = por %p4302_p1, %p158_p11  ;;  %4305 = sst [smem:[#allocation24_spill]] %s4599_s18 }
  0x6e   : > { %s275_s13 = sand.u32 1, %s2104_s23   ;;  %s1211_s16 = smul.u32 6, %s2116_s26 }
  0x6f   : > { %s147_s19 = ssub.s32 %s2120_s27, %s4599_s18  ;;  %s1210_s30 = smul.u32 24, %s275_s13 }
  0x70   : > { %s148_s29 = sor.u32 %s147_s19, %s146_s17  ;;  %s284_s8 = sadd.s32 %s2120_s27, %s1211_s16 }
  0x71   : > { %p149_p8 = scmp.eq.s32.totalorder %s148_s29, 0  ;;  %s1104_s12 = sshll.u32 %s284_s8, 7 }
  0x72   : > { %s4306_s5 = sld [smem:[#allocation30_spill]]  ;;  %s279_s1 = scalar_lea.vmem [#allocation14], %s1210_s30 }
  0x73   : > { %s2336_s15 = scalar_select %p149_p8, %s2104_s23, %s151_s20  }
  0x74   : > { %s287_s10 = sshll.u32 %s279_s1, 4  ;;  %p2349_p0 = pnand %p1753_p6, %p2323_p10  ;;  %s2343_s10 = int_to_ptr.vmem [resolvable:$true] %s287_s10 }
  0x75   : > { %s2353_s20 = scalar_lea.sflag [#allocation5], %s275_s13 }
  0x76   : > { %p1986_p7 = pneg %p2349_p0 }
  0x78   : > { %s2341_s4 = scalar_lea.hbm %s4306_s5, %s1104_s12  ;;  %s1989_s1 = scalar_lea.hbm %s4306_s5, 1536 }
  0x79   : > { %s1984_s0 = scalar_lea.hbm %s2341_s4, 384  ;;  %p1990_p12 = scmp.lt.u32.totalorder %s2341_s4, %s4306_s5 }
  0x7a   : > { %p1985_p5 = scmp.ne.s32.totalorder %s2341_s4, %s1984_s0  ;;  %p1991_p11 = scmp.lt.u32.totalorder %s1989_s1, %s1984_s0 }
  0x7b   : > { %p1993_p3 = scmp.lt.u32.totalorder %s1984_s0, %s2341_s4 }
  0x7c   : > { %p1987_p2 = pnand %p1986_p7, %p1985_p5  ;;  %p1992_p13 = por %p1991_p11, %p1990_p12 }
  0x7e   : > { %p1988_p9 = pneg %p1987_p2  ;;  %p1994_p1 = por %p1993_p3, %p1992_p13 }
  0x80   : > { %p1995_p10 = pnand %p1994_p1, %p1988_p9 }
  0x82   : > { %1998 = shalt.err (!%p1995_p10)
}
  0x83   : > { %s1999_s13 = scalar_lea.vmem %s2343_s10, 384  ;;  %s2133_s19 = smov [#allocation14]  }
  0x84   : > { %p2000_p6 = scmp.ne.s32.totalorder %s2343_s10, %s1999_s13  ;;  %s2004_s29 = sshll.u32 %s2133_s19, 4  ;;  %s2005_s29 = int_to_ptr.vmem [resolvable:$false] %s2004_s29 }
  0x85   : > { %s2006_s30 = scalar_lea.vmem %s2005_s29, 768  ;;  %p2007_p2 = scmp.lt.s32.totalorder %s2343_s10, %s2005_s29 }
  0x86   : > { %p2002_p8 = pnand %p2000_p6, %p1986_p7  ;;  %p2008_p12 = scmp.lt.s32.totalorder %s2006_s30, %s1999_s13 }
  0x88   : > { %p2003_p5 = pneg %p2002_p8  ;;  %p2009_p11 = por %p2008_p12, %p2007_p2 }
  0x8a   : > { %p2010_p13 = pnand %p2009_p11, %p2003_p5 }
  0x8c   : > { %2013 = shalt.err (!%p2010_p13)
}
  0x8d   : > { %s2134_s8 = smov 256   ;;  %s4308_s0 = smov 8  }
  0x8e   : > { %s4309_s2 = smov 128   ;;  %p4310_p7 = scmp.ne.s32.totalorder %s4294_s14, 0 }
  0x8f   : > { %1743 = dma.hbm_to_vmem [thread:$0]  (!%p2349_p0), %s2341_s4, 384, %s2343_s10, %s2353_s20, %s2134_s8, %s4309_s2, %s4308_s0  }
  0x90   : > { %299 = sbr.rel (%p4310_p7) target bundleno = 439 (0x1b7), region = 44  ;;  %p4311_p9 = scmp.ne.s32.totalorder (!%p4310_p7), %s4288_s7, 0 }
  0x97   : > { %2075 = dma.done.wait (%p4311_p9), [#allocation7], 16  }
  0x98   : > { %2077 = vsyncadd (%p4311_p9), [#allocation7], 4294967280 }
  0x99   : > { %2079 = dma.done.wait (%p4311_p9), [#allocation9], 32  }
  0x9a   : > { %2081 = vsyncadd (%p4311_p9), [#allocation9], 4294967264 }
  0x9b   : > { %2083 = dma.done.wait (%p4311_p9), [#allocation12], 512  }
  0x9c   : > { %2085 = vsyncadd (%p4311_p9), [#allocation12], 4294966784  ;;  %s2398_s4 = sand.u32 1, %s2100_s22   ;;  %p4312_p0 = scmp.ne.s32.totalorder %s4290_s9, 0 }
  0x9d   : > { %s1212_s10 = smul.u32 24, %s2398_s4  ;;  %s322_s14 = scalar_lea.sflag [#allocation5], %s2398_s4 }
  0x9f   : > { %s2402_s17 = scalar_lea.vmem [#allocation14], %s1212_s10 }
  0xa0   : > { %2087 = dma.done.wait (%p4312_p0), %s322_s14, 384  }
  0xa1   : > { %2089 = vsyncadd (%p4312_p0), %s322_s14, 4294966912 }
  0xa2   : > { %330 = sfence }
  0xa3   : > { %s2409_s7 = scalar_lea.vmem [#allocation15], %s1212_s10  ;;  %p1112_p3 = scmp.ne.s32.totalorder %s2108_s24, 0 }
  0xa4   : > { %s374_s12 = sld [smem:[#allocation10]] (!%p1112_p3)  ;;  %s1122_s1 = sld [smem:[#allocation10 + $0x1]] (!%p1112_p3)  ;;  %v360_v18 = vlaneseq (!%p1112_p3) }
  0xa5   : > { %359 = sbr.rel (%p1112_p3) target bundleno = 412 (0x19c), region = 72  ;;  %s1133_s3 = sld [smem:[#allocation10 + $0x2]] (!%p1112_p3) }
  0xa6   : > { %s1144_s16 = sld [smem:[#allocation10 + $0x3]] (!%p1112_p3)  ;;  %s1155_s19 = sld [smem:[#allocation10 + $0x4]] (!%p1112_p3)  ;;  %v361_v19 = vshrl.u32 (!%p1112_p3), %v360_v18, 7  ;;  %v366_v22 = vand.u32 (!%p1112_p3), 127, %v360_v18 }
  0xa7   : > { %s1166_s30 = sld [smem:[#allocation10 + $0x5]] (!%p1112_p3)  ;;  %s1177_s2 = sld [smem:[#allocation10 + $0x6]] (!%p1112_p3) }
  0xa8   : > { %s1188_s14 = sld [smem:[#allocation10 + $0x7]] (!%p1112_p3)  ;;  %s1199_s27 = sld [smem:[#allocation10 + $0x8]] (!%p1112_p3)  ;;  %v2418_v24 = vcvt.s32.f32 (!%p1112_p3), %v366_v22 }
  0xaa   : > { %s375_s13 = smul.f32 (!%p1112_p3), 25.0, %s374_s12 }
  0xab   : > { %s432_s29 = smul.f32 (!%p1112_p3), 25.0, %s1122_s1 }
  0xac   : > { %s378_s8 = smul.f32 %s375_s13, %s375_s13 }
  0xad   : > { %s435_s0 = smul.f32 %s432_s29, %s432_s29 }
  0xae   : > { %v379_v0 = vstv %s378_s8  ;;  %s492_s9 = smul.f32 25.0, %s1133_s3 }
  0xaf   : > { %1837 = vrcp.f32 %v379_v0  ;;  %v436_v1 = vstv %s435_s0  ;;  %s552_s10 = smul.f32 25.0, %s1144_s16  ;;  %s4313_s0 = sshll.u32 %s2112_s25, 3 }
  0xb0   : > { %1839 = vrcp.f32 %v436_v1  ;;  %s495_s20 = smul.f32 %s492_s9, %s492_s9  ;;  %v362_v20 = vstv %s4313_s0  ;;  %s372_s9 = sld [smem:[#allocation8]] }
  0xb1   : > { %s555_s5 = smul.f32 %s552_s10, %s552_s10  ;;  %s2414_s10 = sld [smem:[#allocation11 + $0x100]]  ;;  %v363_v21 = vadd.s32 %v362_v20, %v361_v19 }
  0xb2   : > { %v496_v2 = vstv %s495_s20  ;;  %s612_s18 = smul.f32 25.0, %s1155_s19  ;;  %s1119_s19 = sld [smem:[#allocation11 + $0x80]] }
  0xb3   : > { %1841 = vrcp.f32 %v496_v2  ;;  %v556_v3 = vstv %s555_s5  ;;  %s672_s12 = smul.f32 25.0, %s1166_s30  ;;  %s1120_s30 = sld [smem:[#allocation11 + $0x81]]  ;;  %v2416_v23 = vcvt.s32.f32 %v363_v21 }
  0xb4   : > { %1843 = vrcp.f32 %v556_v3  ;;  %s615_s1 = smul.f32 %s612_s18, %s612_s18  ;;  %s1113_s18 = sld [smem:[#allocation11 + $0x1]] }
  0xb5   : > { %s675_s13 = smul.f32 %s672_s12, %s672_s12  ;;  %s1131_s12 = sld [smem:[#allocation11 + $0x101]] }
  0xb6   : > { %v616_v4 = vstv %s615_s1  ;;  %s732_s29 = smul.f32 25.0, %s1177_s2 }
  0xb7   : > { %1845 = vrcp.f32 %v616_v4  ;;  %v676_v5 = vstv %s675_s13  ;;  %s792_s3 = smul.f32 25.0, %s1188_s14 }
  0xb8   : > { %1847 = vrcp.f32 %v676_v5  ;;  %s735_s16 = smul.f32 %s732_s29, %s732_s29  ;;  %s2420_s29 = sld [smem:[#allocation11 + $0x180]] }
  0xb9   : > { %v1838_v6 = vpop.eup %1837  ;;  %s795_s8 = smul.f32 %s792_s3, %s792_s3  ;;  %s2422_s3 = sld [smem:[#allocation11 + $0x181]] }
  0xba   : > { %v1840_v7 = vpop.eup %1839  ;;  %1213 = vpush %v1838_v6  ;;  %v736_v8 = vstv %s735_s16  ;;  %s852_s20 = smul.f32 25.0, %s1199_s27  ;;  %s368_s27 = sld [smem:[#allocation11]] }
  0xbb   : > { %1267 = vpush %v1840_v7  ;;  %1849 = vrcp.f32 %v736_v8  ;;  %v796_v9 = vstv %s795_s8  ;;  %s371_s14 = smul.f32 127.0, %s1113_s18  ;;  %s2424_s8 = sld [smem:[#allocation8 + $0x1]] }
  0xbc   : > { %1851 = vrcp.f32 %v796_v9  ;;  %s855_s5 = smul.f32 %s852_s20, %s852_s20  ;;  %s2433_s18 = sld [smem:[#allocation11 + $0x201]] }
  0xbd   : > { %v1842_v10 = vpop.eup %1841  ;;  %s426_s1 = smul.f32 15.0, %s1119_s19  ;;  %v385_v26 = vstv %s371_s14  ;;  %s2437_s19 = sld [smem:[#allocation8 + $0x2]] }
  0xbe   : > { %v1844_v11 = vpop.eup %1843  ;;  %1321 = vpush %v1842_v10  ;;  %v856_v12 = vstv %s855_s5  ;;  %s428_s13 = smul.f32 127.0, %s1120_s30  ;;  %v386_v30 = vsub.f32 %v2418_v24, %v385_v26 }
  0xbf   : > { %1375 = vpush %v1844_v11  ;;  %1853 = vrcp.f32 %v856_v12  ;;  %s373_s16 = smul.f32 2.0, %s372_s9  ;;  %v439_v27 = vstv %s426_s1 }
  0xc0   : > { %s369_s2 = smul.f32 15.0, %s368_s27  ;;  %v442_v28 = vstv %s428_s13  ;;  %v440_v31 = vsub.f32 %v2416_v23, %v439_v27  ;;  %s2431_s27 = sld [smem:[#allocation11 + $0x200]]  ;;  %v387_v35 = vmul.f32 %v386_v30, %v386_v30 }
  0xc1   : > { %v1846_v13 = vpop.eup %1845  ;;  %s486_s20 = smul.f32 15.0, %s2414_s10  ;;  %v443_v32 = vsub.f32 %v2418_v24, %v442_v28  ;;  %v2435_v33 = vstv %s373_s16  ;;  %s2471_s16 = sld [smem:[#allocation8 + $0x4]] }
  0xc2   : > { %v1848_v14 = vpop.eup %1847  ;;  %1429 = vpush %v1846_v13  ;;  %v382_v25 = vstv %s369_s2  ;;  %s488_s5 = smul.f32 127.0, %s1131_s12  ;;  %v441_v38 = vmul.f32 %v440_v31, %v440_v31  ;;  %v2442_v40 = vand.u32 2147483647, %v2435_v33  ;;  %s2447_s2 = sld [smem:[#allocation8 + $0x3]]  ;;  %v1224_v61 = vtrunc.f32 %v2435_v33 }
  0xc3   : > { %1483 = vpush %v1848_v14  ;;  %v383_v29 = vsub.f32 %v2416_v23, %v382_v25  ;;  %v499_v36 = vstv %s486_s20  ;;  %s546_s30 = smul.f32 15.0, %s2420_s29  ;;  %v444_v39 = vmul.f32 %v443_v32, %v443_v32  ;;  %s2459_s29 = sld [smem:[#allocation13]]  ;;  %vm4271_vm2 = vcmp.lt.f32.partialorder %v2435_v33, 0 }
  0xc4   : > { %v502_v37 = vstv %s488_s5  ;;  %s548_s0 = smul.f32 127.0, %s2422_s3  ;;  %v500_v41 = vsub.f32 %v2416_v23, %v499_v36  ;;  %v1228_v47 = vtrunc.f32 %v2442_v40  ;;  %s2461_s3 = sld [smem:[#allocation13 + $0x1]]  ;;  %vm4269_vm0 = vcmp.eq.f32.partialorder %v2442_v40, 2139095040 }
  0xc5   : > { %v1850_v15 = vpop.eup %1849  ;;  %v384_v34 = vmul.f32 %v383_v29, %v383_v29  ;;  %s430_s9 = smul.f32 2.0, %s2424_s8  ;;  %v503_v42 = vsub.f32 %v2418_v24, %v502_v37  ;;  %v445_v44 = vadd.f32 %v444_v39, %v441_v38  ;;  %v559_v45 = vstv %s546_s30  ;;  %s2474_s8 = sld [smem:[#allocation13 + $0x2]] }
  0xc6   : > { %v1852_v16 = vpop.eup %1851  ;;  %1537 = vpush %v1850_v15  ;;  %v562_v46 = vstv %s548_s0  ;;  %s606_s10 = smul.f32 15.0, %s2431_s27  ;;  %v501_v50 = vmul.f32 %v500_v41, %v500_v41  ;;  %v560_v54 = vsub.f32 %v2416_v23, %v559_v45  ;;  %v1229_v62 = vcvt.f32.s32 %v1228_v47  ;;  %s2480_s27 = sld [smem:[#allocation4]] }
  0xc7   : > { %1591 = vpush %v1852_v16  ;;  %v388_v43 = vadd.f32 %v387_v35, %v384_v34  ;;  %s608_s12 = smul.f32 127.0, %s2433_s18  ;;  %v2452_v49 = vstv %s430_s9  ;;  %v504_v51 = vmul.f32 %v503_v42, %v503_v42  ;;  %v563_v55 = vsub.f32 %v2418_v24, %v562_v46  ;;  %s2485_s18 = sld [smem:[#allocation13 + $0x80]] }
  0xc8   : > { %s490_s13 = smul.f32 2.0, %s2437_s19  ;;  %v2469_v58 = vand.u32 2147483647, %v2452_v49  ;;  %v619_v59 = vstv %s606_s10  ;;  %v561_v1 = vmul.f32 %v560_v54, %v560_v54  ;;  %s2490_s19 = sld [smem:[#allocation13 + $0x81]]  ;;  %vm2499_vm1 = vcmp.ne.f32.partialorder %v2435_v33, %v1224_v61 }
  0xc9   : > { %v1854_v17 = vpop.eup %1853  ;;  %v622_v60 = vstv %s608_s12  ;;  %v505_v0 = vadd.f32 %v504_v51, %v501_v50  ;;  %s550_s5 = smul.f32 2.0, %s2447_s2  ;;  %v564_v2 = vmul.f32 %v563_v55, %v563_v55  ;;  %v620_v4 = vsub.f32 %v2416_v23, %v619_v59  ;;  %s2508_s0 = sld [smem:[#allocation11 + $0x280]]  ;;  %vm2523_vm3 = vmor %vm2499_vm1, %vm4269_vm0 }
  0xca   : > { %1645 = vpush %v1854_v17  ;;  %v2476_v63 = vstv %s490_s13  ;;  %v623_v5 = vsub.f32 %v2418_v24, %v622_v60  ;;  %v1282_v6 = vtrunc.f32 %v2469_v58  ;;  %v1230_v9 = vand.u32 1, %v1229_v62  ;;  %s1114_s9 = sadd.f32 -0.485, %s2459_s29  ;;  %s2513_s2 = sld [smem:[#allocation11 + $0x281]]  ;;  %vm1232_vm7 = vmneg %vm2523_vm3 }
  0xcb   : > { %v2493_v7 = vand.u32 2147483647, %v2476_v63  ;;  %v1278_v11 = vtrunc.f32 %v2452_v49  ;;  %v565_v13 = vadd.f32 %v564_v2, %v561_v1  ;;  %v2506_v14 = vstv %s550_s5  ;;  %s1116_s10 = sadd.f32 -0.456, %s2461_s3  ;;  %s2534_s13 = sld [smem:[#allocation4 + $0x1]] }
  0xcc   : > { %v621_v16 = vmul.f32 %v620_v4, %v620_v4  ;;  %v624_v17 = vmul.f32 %v623_v5, %v623_v5  ;;  %v1283_v18 = vcvt.f32.s32 %v1282_v6  ;;  %s1118_s12 = sadd.f32 -0.406, %s2474_s8  ;;  %vm4267_vm4 = vcmp.eq.f32.partialorder %v2469_v58, 2139095040  ;;  %s2541_s29 = sld [smem:[#allocation13 + $0x82]] }
  0xcd   : > { %v1336_v19 = vtrunc.f32 %v2493_v7  ;;  %v2530_v21 = vand.u32 2147483647, %v2506_v14  ;;  %vm2537_vm5 = vcmp.ne.f32.partialorder %v2452_v49, %v1278_v11  ;;  %v1332_v26 = vtrunc.f32 %v2476_v63  ;;  %s2562_s5 = smul.f32 4.366812, %s1114_s9  ;;  %s2587_s9 = sld [smem:[#allocation13 + $0x100]] }
  0xce   : > { %vm2550_vm6 = vcmp.eq.s32.totalorder %v1230_v9, 1  ;;  %v2135_v29 = vmov 0   ;;  %v625_v31 = vadd.f32 %v624_v17, %v621_v16  ;;  %v1284_v34 = vand.u32 1, %v1283_v18  ;;  %vm2582_vm8 = vmor %vm2537_vm5, %vm4267_vm4 }
  0xcf   : > { %v2557_v30 = vsel %vm4271_vm2, 2139095040, %v2135_v29  ;;  %v1337_v35 = vcvt.f32.s32 %v1336_v19  ;;  %v2136_v39 = vmov 2139095040   ;;  %vm4266_vm9 = vcmp.eq.f32.partialorder %v2493_v7, 2139095040  ;;  %s666_s3 = smul.f32 15.0, %s2508_s0  ;;  %vm2609_vm12 = vmand %vm2550_vm6, %vm1232_vm7 }
  0xd0   : > { %v2572_v41 = vsel %vm4271_vm2, 0, %v2136_v39  ;;  %vm2592_vm10 = vcmp.ne.f32.partialorder %v2476_v63, %v1332_v26  ;;  %v1386_v46 = vtrunc.f32 %v2506_v14  ;;  %vm1227_vm11 = vcmp.lt.f32.partialorder %v2442_v40, 1266679808  ;;  %vm1286_vm14 = vmneg %vm2582_vm8 }
  0xd1   : > { %v1256_v51 = vxor.u32 2147483648, %v2572_v41  ;;  %vm2626_vm13 = vcmp.eq.s32.totalorder %v1284_v34, 1  ;;  %v1338_v55 = vand.u32 1, %v1337_v35  ;;  %v406_v60 = vstv %s2562_s5  ;;  %vm2647_vm1 = vmor %vm2592_vm10, %vm4266_vm9  ;;  %s3751_s5 = sld [smem:[#allocation13 + $0x180]] }
  0xd2   : > { %vm4270_vm15 = vcmp.lt.f32.partialorder %v2452_v49, 0  ;;  %vm2655_vm5 = vmand %vm1227_vm11, %vm2609_vm12  ;;  %vm1281_vm6 = vcmp.lt.f32.partialorder %v2469_v58, 1266679808  ;;  %vm4268_vm7 = vcmp.eq.f32.partialorder %v2530_v21, 2139095040  ;;  %vm2663_vm10 = vcmp.ne.f32.partialorder %v2506_v14, %v1386_v46  ;;  %s1129_s8 = sadd.f32 -0.406, %s2541_s29  ;;  %s2724_s29 = sld [smem:[#allocation8 + $0x5]] }
  0xd3   : > { %vm2673_vm11 = vmand %vm2626_vm13, %vm1286_vm14  ;;  %v679_v8 = vstv %s666_s3  ;;  %v2687_v11 = vsel %vm4270_vm15, 0, %v2136_v39  ;;  %vm2694_vm12 = vcmp.eq.s32.totalorder %v1338_v55, 1  ;;  %v2704_v16 = vsel %vm2655_vm5, %v1256_v51, %v2572_v41  ;;  %s1136_s3 = sadd.f32 -0.485, %s2587_s9 }
  0xd4   : > { %vm1340_vm13 = vmneg %vm2647_vm1  ;;  %v2710_v18 = vsel %vm4270_vm15, 2139095040, %v2135_v29  ;;  %v680_v28 = vsub.f32 %v2416_v23, %v679_v8 }
  0xd5   : > { %vm2720_vm14 = vmor %vm2663_vm10, %vm4268_vm7  ;;  %vm4274_vm10 = vcmp.lt.f32.partialorder %v2476_v63, 0  ;;  %vm1335_vm7 = vcmp.lt.f32.partialorder %v2493_v7, 1266679808 }
  0xd6   : > { %vm2731_vm4 = vmand %vm1281_vm6, %vm2673_vm11  ;;  %v2782_v54 = vsel %vm4274_vm10, 0, %v2136_v39 }
  0xd7   : > { %vm2746_vm6 = vmand %vm2694_vm12, %vm1340_vm13 }
  0xd8   : > { %vm1394_vm11 = vmneg %vm2720_vm14 }
  0xeb   : > { %s1214_s14 = spop %1213 }
  0xec   : > { %v389_v48 = vstv %s1214_s14  ;;  %s1268_s1 = spop %1267  ;;  %s610_s14 = smul.f32 2.0, %s2471_s16 }
  0xed   : > { %v2455_v52 = vmul.f32 %v389_v48, %v388_v43  ;;  %v446_v53 = vstv %s1268_s1  ;;  %s377_s16 = smul.f32 0.3, %s2480_s27  ;;  %v1390_v43 = vtrunc.f32 %v2530_v21  ;;  %s2641_s27 = sld [smem:[#allocation4 + $0x2]] }
  0xee   : > { %v2463_v56 = vmul.f32 %v446_v53, %v445_v44  ;;  %v2566_v37 = vstv %s610_s14  ;;  %s668_s14 = smul.f32 127.0, %s2513_s2 }
  0xef   : > { %v2466_v57 = vand.u32 2147483647, %v2455_v52  ;;  %s1322_s20 = spop %1321  ;;  %v2616_v50 = vand.u32 2147483647, %v2566_v37  ;;  %v2624_v53 = vstv %s377_s16  ;;  %s2638_s2 = smul.f32 4.4444447, %s1118_s12 }
  0xf0   : > { %v2483_v3 = vand.u32 2147483647, %v2463_v56  ;;  %s2495_s30 = spop %1375  ;;  %v506_v10 = vstv %s1322_s20  ;;  %s2576_s20 = smul.f32 4.4642854, %s1116_s10  ;;  %v682_v9 = vstv %s668_s14  ;;  %vm4272_vm9 = vcmp.lt.f32.partialorder %v2455_v52, 0 }
  0xf1   : > { %1855 = vlog2.f32 %v2466_v57  ;;  %v2504_v12 = vmul.f32 %v506_v10, %v505_v0  ;;  %v566_v15 = vstv %s2495_s30  ;;  %s2601_s10 = sld [smem:[#allocation11 + $0x300]]  ;;  %s2632_s30 = sld [smem:[#allocation13 + $0x101]]  ;;  %v1391_v0 = vcvt.f32.s32 %v1390_v43  ;;  %vm2772_vm0 = vmand %vm4272_vm9, %vm2523_vm3 }
  0xf2   : > { %1857 = vlog2.f32 %v2483_v3  ;;  %v2547_v27 = vmul.f32 %v566_v15, %v565_v13  ;;  %v1444_v6 = vtrunc.f32 %v2616_v50  ;;  %s4338_s12 = sadd.f32 -0.485, %s2485_s18  ;;  %v1440_v15 = vtrunc.f32 %v2566_v37  ;;  %vm2795_vm3 = vmand %vm1335_vm7, %vm2746_vm6 }
  0xf3   : > { %s2532_s1 = spop %1429  ;;  %v2544_v25 = vand.u32 2147483647, %v2504_v12  ;;  %s4341_s18 = sadd.f32 -0.456, %s2490_s19  ;;  %v1392_v22 = vand.u32 1, %v1391_v0  ;;  %vm4273_vm12 = vcmp.eq.f32.partialorder %v2616_v50, 2139095040  ;;  %v681_v0 = vmul.f32 %v680_v28, %v680_v28 }
  0xf4   : > { %v626_v36 = vstv %s2532_s1  ;;  %v2597_v45 = vand.u32 2147483647, %v2547_v27  ;;  %s2619_s1 = sld [smem:[#allocation11 + $0x301]]  ;;  %s2691_s16 = smul.f32 4.366812, %s4338_s12  ;;  %v1445_v35 = vcvt.f32.s32 %v1444_v6  ;;  %vm2764_vm13 = vcmp.ne.f32.partialorder %v2566_v37, %v1440_v15 }
  0xf5   : > { %1859 = vlog2.f32 %v2544_v25  ;;  %v2613_v48 = vmul.f32 %v626_v36, %v625_v31  ;;  %s2714_s0 = smul.f32 4.4642854, %s4341_s18  ;;  %v683_v31 = vsub.f32 %v2418_v24, %v682_v9  ;;  %vm2784_vm15 = vcmp.eq.s32.totalorder %v1392_v22, 1  ;;  %vm2806_vm9 = vmor %vm2764_vm13, %vm4273_vm12 }
  0xf6   : > { %s4348_s12 = smul.f32 0.3, %s2534_s13  ;;  %vm1239_vm2 = vcmp.gt.f32.partialorder %v2466_v57, 1065353216  ;;  %v4357_v6 = vmov 0  ;;  %v1446_v8 = vand.u32 1, %v1445_v35  ;;  %v2822_v28 = vsel %vm4274_vm10, 2139095040, %v2135_v29  ;;  %vm2831_vm7 = vmand %vm2784_vm15, %vm1394_vm11 }
  0xf7   : > { %v2678_v5 = vand.u32 2147483647, %v2613_v48  ;;  %s2757_s18 = smul.f32 4.4444447, %s1129_s8  ;;  %s1138_s19 = sadd.f32 -0.456, %s2632_s30  ;;  %v684_v2 = vmul.f32 %v683_v31, %v683_v31 }
  0xf8   : > { %s494_s13 = smul.f32 0.3, %s2641_s27  ;;  %v4358_v6 = vsel %vm2806_vm9, 4294967295, %v4357_v6  ;;  %vm4362_vm6 = vcmp.lt.f32.partialorder %v2435_v33, 0  ;;  %v1364_v35 = vxor.u32 2147483648, %v2782_v54  ;;  %vm2870_vm12 = vcmp.eq.s32.totalorder %v1446_v8, 1 }
  0xf9   : > { %s2800_s30 = smul.f32 4.366812, %s1136_s3  ;;  %vm2844_vm13 = vmxor %vm4362_vm6, %vm1239_vm2  ;;  %vm1389_vm2 = vcmp.lt.f32.partialorder %v2530_v21, 1266679808  ;;  %s3082_s3 = sld [smem:[#allocation11 + $0x381]] }
  0xfa   : > { %s728_s14 = smul.f32 127.0, %s2619_s1  ;;  %vm4365_vm10 = vmmov %vm4362_vm6  ;;  %vm4372_vm6 = vcmp.lt.f32.partialorder %v2506_v14, 0 }
  0xfb   : > { %v1856_v32 = vpop.eup %1855  ;;  %s4359_s9 = smul.f32 15.0, %s2601_s10  ;;  %s2835_s10 = spop %1483  ;;  %v2894_v8 = vsel %vm4372_vm6, 2139095040, %v2135_v29  ;;  %vm4373_vm11 = vmmov %vm4372_vm6 }
  0xfc   : > { %v1217_v38 = vmul.f32 %v1856_v32, %v2435_v33  ;;  %v1858_v59 = vpop.eup %1857  ;;  %v1310_v32 = vxor.u32 2147483648, %v2687_v11  ;;  %s2824_s1 = smul.f32 4.4642854, %s1138_s19  ;;  %s2944_s8 = spop %1537 }
  0xfd   : > { %v1271_v10 = vmul.f32 %v1858_v59, %v2452_v49  ;;  %v4355_v59 = vmov 0  ;;  %v739_v9 = vstv %s4359_s9  ;;  %s670_s27 = smul.f32 2.0, %s2724_s29  ;;  %s3006_s29 = sld [smem:[#allocation8 + $0x6]] }
  0xfe   : > { %1861 = vpow2.f32 %v1217_v38  ;;  %v2755_v38 = vstv %s4348_s12  ;;  %v4356_v59 = vsel %vm2795_vm3, 4294967295, %v4355_v59  ;;  %v2816_v15 = vsel %vm2731_vm4, %v1310_v32, %v2687_v11  ;;  %s3062_s19 = sld [smem:[#allocation11 + $0x380]]  ;;  %s3242_s9 = sld [smem:[#allocation13 + $0x102]] }
  0xff   : > { %1863 = vlog2.f32 %v2597_v45  ;;  %v1860_v36 = vpop.eup %1859  ;;  %v740_v43 = vsub.f32 %v2416_v23, %v739_v9 }
 0x100   : > { %1865 = vlog2.f32 %v2678_v5  ;;  %v1325_v4 = vmul.f32 %v1860_v36, %v2476_v63  ;;  %v2851_v36 = vstv %s494_s13  ;;  %s788_s13 = smul.f32 127.0, %s3082_s3 }
 0x101   : > { %1867 = vpow2.f32 %v1271_v10  ;;  %v742_v10 = vstv %s728_s14  ;;  %v741_v47 = vmul.f32 %v740_v43, %v740_v43 }
 0x102   : > { %1869 = vpow2.f32 %v1325_v4 }
 0x103   : > { %s730_s14 = smul.f32 2.0, %s3006_s29  ;;  %s3377_s29 = spop %1591 }
 0x104   : > { %s786_s12 = smul.f32 15.0, %s3062_s19 }
 0x108   : > { %v1862_v44 = vpop.eup %1861 }
 0x109   : > { %v1242_v20 = vsel %vm2772_vm0, 2143289344, %v1862_v44  ;;  %v1864_v13 = vpop.eup %1863  ;;  %vm1236_vm0 = vcmp.eq.f32.partialorder %v2455_v52, 0  ;;  %v743_v44 = vsub.f32 %v2418_v24, %v742_v10  ;;  %v2901_v10 = vstv %s670_s27  ;;  %s1140_s27 = sadd.f32 -0.406, %s3242_s9 }
 0x10a   : > { %v1244_v32 = vsel %vm1236_vm0, %v2557_v30, %v1242_v20  ;;  %v685_v30 = vadd.f32 %v684_v2, %v681_v0  ;;  %vm2865_vm15 = vmand %vm4365_vm10, %vm1236_vm0  ;;  %v1379_v55 = vmul.f32 %v1864_v13, %v2506_v14  ;;  %v686_v0 = vstv %s2835_s10  ;;  %v1866_v22 = vpop.eup %1865  ;;  %s3344_s10 = sld [smem:[#allocation4 + $0x3]] }
 0x10b   : > { %v1246_v2 = vxor.u32 2147483648, %v1244_v32  ;;  %vm2887_vm0 = vmand %vm1389_vm2, %vm2831_vm7  ;;  %v2899_v13 = vsel %vm4373_vm11, 0, %v2136_v39  ;;  %v1868_v9 = vpop.eup %1867  ;;  %v744_v17 = vmul.f32 %v743_v44, %v743_v44  ;;  %vm4377_vm11 = vcmp.lt.s32.totalorder %v2455_v52, 0  ;;  %s3414_s19 = smul.f32 4.4444447, %s1140_s27  ;;  %s3657_s27 = sld [smem:[#allocation8 + $0x8]] }
 0x10c   : > { %vm4374_vm7 = vmneg %vm2806_vm9  ;;  %v2913_v51 = vmul.f32 %v686_v0, %v685_v30  ;;  %v2929_v30 = vsel %vm2795_vm3, %v1364_v35, %v2782_v54  ;;  %1871 = vpow2.f32 %v1379_v55  ;;  %v2942_v34 = vand.u32 2147483647, %v2901_v10  ;;  %v1870_v1 = vpop.eup %1869 }
 0x10d   : > { %vm2909_vm2 = vmand %vm2870_vm12, %vm4374_vm7  ;;  %vm1290_vm12 = vcmp.eq.f32.partialorder %v2463_v56, 0  ;;  %vm1293_vm7 = vcmp.gt.f32.partialorder %v2483_v3, 1065353216  ;;  %v745_v55 = vadd.f32 %v744_v17, %v741_v47  ;;  %v1494_v47 = vtrunc.f32 %v2901_v10 }
 0x10e   : > { %vm1245_vm6 = vmand %vm4377_vm11, %vm2655_vm5  ;;  %vm4379_vm5 = vcmp.lt.f32.partialorder %v2463_v56, 0  ;;  %vm4277_vm3 = vcmp.eq.f32.partialorder %v2504_v12, 0  ;;  %vm4405_vm9 = vcmp.lt.f32.partialorder %v2566_v37, 0 }
 0x10f   : > { %vm4378_vm10 = vmor %vm2865_vm15, %vm2844_vm13  ;;  %v1247_v43 = vsel %vm1245_vm6, %v1246_v2, %v1244_v32  ;;  %vm1252_vm15 = vcmp.eq.f32.partialorder %v2455_v52, 3212836864  ;;  %v1433_v32 = vmul.f32 %v1866_v22, %v2566_v37  ;;  %v2970_v22 = vand.u32 2147483647, %v2913_v51 }
 0x110   : > { %v1251_v20 = vsel %vm4378_vm10, 2139095040, %v2135_v29  ;;  %vm2936_vm11 = vmand %vm4379_vm5, %vm2582_vm8  ;;  %vm4382_vm8 = vcmp.lt.f32.partialorder %v2616_v50, 1266679808  ;;  %vm4385_vm10 = vcmp.lt.f32.partialorder %v2452_v49, 0  ;;  %vm4394_vm5 = vcmp.ne.f32.partialorder %v2455_v52, %v2455_v52  ;;  %s554_s3 = smul.f32 0.3, %s3344_s10 }
 0x111   : > { %v1296_v42 = vsel %vm2936_vm11, 2143289344, %v1868_v9  ;;  %vm2956_vm6 = vmand %vm4382_vm8, %vm2909_vm2  ;;  %v1253_v44 = vsel %vm1252_vm15, 1065353216, %v1251_v20  ;;  %vm4388_vm2 = vcmp.eq.f32.partialorder %v2442_v40, 2139095040  ;;  %v1418_v9 = vxor.u32 2147483648, %v2899_v13 }
 0x112   : > { %vm2965_vm13 = vmand %vm4385_vm10, %vm1290_vm12  ;;  %v1254_v0 = vsel %vm4388_vm2, %v1253_v44, %v1247_v43  ;;  %v746_v20 = vstv %s2944_s8  ;;  %vm4393_vm2 = vcmp.ne.f32.partialorder %v2435_v33, %v2435_v33  ;;  %v1298_v17 = vsel %vm1290_vm12, %v2710_v18, %v1296_v42  ;;  %s3363_s8 = sld [smem:[#allocation8 + $0x7]] }
 0x113   : > { %vm4389_vm11 = vmmov %vm4385_vm10  ;;  %vm4392_vm10 = vcmp.lt.f32.partialorder %v2566_v37, 0  ;;  %v1498_v43 = vtrunc.f32 %v2942_v34  ;;  %vm4399_vm12 = vcmp.eq.f32.partialorder %v2455_v52, 1065353216  ;;  %1873 = vpow2.f32 %v1433_v32 }
 0x114   : > { %vm2978_vm15 = vmxor %vm4389_vm11, %vm1293_vm7  ;;  %v2986_v31 = vsel %vm4392_vm10, 0, %v2136_v39  ;;  %vm1240_vm10 = vcmp.eq.f32.partialorder %v2466_v57, 2139095040  ;;  %vm1292_vm11 = vcmp.lt.s32.totalorder %v2463_v56, 0  ;;  %1875 = vlog2.f32 %v2970_v22 }
 0x115   : > { %vm2996_vm7 = vmor %vm4394_vm5, %vm4393_vm2  ;;  %vm4397_vm5 = vcmp.lt.f32.partialorder %v2455_v52, 0  ;;  %vm4398_vm2 = vcmp.eq.f32.partialorder %v2435_v33, 0  ;;  %v3028_v57 = vmul.f32 %v746_v20, %v745_v55  ;;  %v3044_v32 = vsel %vm4405_vm9, 2139095040, %v2135_v29 }
 0x116   : > { %v1258_v44 = vsel %vm4397_vm5, %v2704_v16, %v2572_v41  ;;  %vm3017_vm8 = vmor %vm4399_vm12, %vm4398_vm2  ;;  %v1300_v41 = vxor.u32 2147483648, %v1298_v17  ;;  %vm1347_vm2 = vcmp.gt.f32.partialorder %v2544_v25, 1065353216  ;;  %v1472_v55 = vxor.u32 2147483648, %v2986_v31 }
 0x117   : > { %v1259_v42 = vsel %vm1240_vm10, %v1258_v44, %v1254_v0  ;;  %vm4402_vm10 = vcmp.lt.f32.partialorder %v2504_v12, 0  ;;  %vm3049_vm5 = vmand %vm1292_vm11, %vm2731_vm4  ;;  %v3059_v20 = vsel %vm2887_vm0, %v1418_v9, %v2899_v13  ;;  %v1872_v44 = vpop.eup %1871  ;;  %vm4408_vm4 = vcmp.lt.f32.partialorder %v2476_v63, 0 }
 0x118   : > { %vm3037_vm12 = vmand %vm4402_vm10, %vm2647_vm1  ;;  %v1263_v26 = vsel %vm2996_vm7, 2143289344, %v1259_v42  ;;  %v3080_v16 = vcvt.f32.s32 %v1498_v43  ;;  %vm4414_vm9 = vcmp.lt.f32.partialorder %v2476_v63, 0  ;;  %vm1401_vm1 = vcmp.gt.f32.partialorder %v2597_v45, 1065353216 }
 0x119   : > { %v1350_v62 = vsel %vm3037_vm12, 2143289344, %v1870_v1  ;;  %vm3070_vm11 = vmand %vm4408_vm4, %vm4277_vm3  ;;  %vm3076_vm12 = vcmp.ne.f32.partialorder %v2901_v10, %v1494_v47  ;;  %vm1306_vm4 = vcmp.eq.f32.partialorder %v2463_v56, 3212836864  ;;  %v3101_v43 = vand.u32 2147483647, %v3028_v57 }
 0x11a   : > { %vm4413_vm7 = vmor %vm2965_vm13, %vm2978_vm15  ;;  %v1301_v46 = vsel %vm3049_vm5, %v1300_v41, %v1298_v17  ;;  %vm4417_vm15 = vcmp.eq.f32.partialorder %v2504_v12, 0  ;;  %v3121_v61 = vsel %vm2956_vm6, %v1472_v55, %v2986_v31  ;;  %v1265_v17 = vsel %vm3017_vm8, 1065353216, %v1263_v26 }
 0x11b   : > { %v1305_v40 = vsel %vm4413_vm7, 2139095040, %v2135_v29  ;;  %vm3095_vm10 = vmxor %vm4414_vm9, %vm1347_vm2  ;;  %v1352_v2 = vsel %vm4417_vm15, %v2822_v28, %v1350_v62  ;;  %vm4418_vm2 = vcmp.lt.f32.partialorder %v2547_v27, 0  ;;  %vm1294_vm5 = vcmp.eq.f32.partialorder %v2483_v3, 2139095040 }
 0x11c   : > { %vm3114_vm9 = vmand %vm4418_vm2, %vm2720_vm14  ;;  %vm1346_vm7 = vcmp.lt.s32.totalorder %v2504_v12, 0  ;;  %vm4421_vm14 = vcmp.eq.f32.partialorder %v2547_v27, 0  ;;  %vm4422_vm15 = vcmp.lt.f32.partialorder %v2506_v14, 0  ;;  %vm4425_vm13 = vcmp.eq.f32.partialorder %v2942_v34, 2139095040 }
 0x11d   : > { %v1404_v19 = vsel %vm3114_vm9, 2143289344, %v1872_v44  ;;  %vm3133_vm2 = vmand %vm4422_vm15, %vm4421_vm14  ;;  %v1307_v41 = vsel %vm1306_vm4, 1065353216, %v1305_v40  ;;  %vm4428_vm9 = vcmp.lt.f32.partialorder %v2463_v56, 0  ;;  %v1500_v62 = vand.u32 1, %v3080_v16 }
 0x11e   : > { %vm3141_vm8 = vmor %vm3076_vm12, %vm4425_vm13  ;;  %v1312_v55 = vsel %vm4428_vm9, %v2816_v15, %v2687_v11  ;;  %vm4431_vm4 = vcmp.eq.f32.partialorder %v2469_v58, 2139095040  ;;  %v1354_v26 = vxor.u32 2147483648, %v1352_v2  ;;  %1877 = vlog2.f32 %v3101_v43  ;;  %v1874_v11 = vpop.eup %1873 }
 0x11f   : > { %vm3158_vm12 = vmxor %vm4422_vm15, %vm1401_vm1  ;;  %v1308_v44 = vsel %vm4431_vm4, %v1307_v41, %v1301_v46  ;;  %vm4432_vm1 = vcmp.eq.f32.partialorder %v2435_v33, 1065353216  ;;  %vm4433_vm13 = vnez %v4356_v59  ;;  %v1876_v9 = vpop.eup %1875  ;;  %v3203_v59 = vstv %s730_s14  ;;  %s790_s14 = smul.f32 2.0, %s3363_s8  ;;  %s3695_s8 = spop %1645 }
 0x120   : > { %v1266_v58 = vsel %vm4432_vm1, %v2455_v52, %v1265_v17  ;;  %vm3183_vm9 = vmand %vm1346_vm7, %vm4433_vm13  ;;  %vm4436_vm1 = vcmp.lt.f32.partialorder %v2504_v12, 0  ;;  %vm1452_vm7 = vcmp.eq.f32.partialorder %v2613_v48, 0  ;;  %vm4439_vm15 = vnez %v4358_v6 }
 0x121   : > { %v1366_v33 = vsel %vm4436_vm1, %v2929_v30, %v2782_v54  ;;  %vm4437_vm4 = vmmov %vm4421_vm14  ;;  %v1313_v54 = vsel %vm1294_vm5, %v1312_v55, %v1308_v44  ;;  %vm1455_vm14 = vcmp.gt.f32.partialorder %v2678_v5, 1065353216  ;;  %vm4440_vm3 = vcmp.lt.f32.partialorder %v2613_v48, 0 }
 0x122   : > { %v1406_v52 = vsel %vm4437_vm4, %v2894_v8, %v1404_v19  ;;  %vm4438_vm4 = vmor %vm3070_vm11, %vm3095_vm10  ;;  %v393_v30 = vsub.f32 0.0, %v1266_v58  ;;  %vm4443_vm11 = vcmp.ne.f32.partialorder %v2452_v49, %v2452_v49  ;;  %vm4444_vm10 = vcmp.ne.f32.partialorder %v2463_v56, %v2463_v56 }
 0x123   : > { %v1359_v8 = vsel %vm4438_vm4, 2139095040, %v2135_v29  ;;  %vm3222_vm13 = vmand %vm4440_vm3, %vm4439_vm15  ;;  %v1355_v6 = vsel %vm3183_vm9, %v1354_v26, %v1352_v2  ;;  %v1408_v40 = vxor.u32 2147483648, %v1406_v52  ;;  %vm1402_vm4 = vcmp.eq.f32.partialorder %v2597_v45, 2139095040 }
 0x124   : > { %vm3233_vm5 = vmor %vm4444_vm10, %vm4443_vm11  ;;  %v1458_v47 = vsel %vm3222_vm13, 2143289344, %v1874_v11  ;;  %vm4447_vm11 = vcmp.lt.s32.totalorder %v2547_v27, 0  ;;  %v1487_v2 = vmul.f32 %v1876_v9, %v2901_v10  ;;  %v3258_v42 = vand.u32 2147483647, %v3203_v59 }
 0x125   : > { %vm3250_vm10 = vmand %vm4447_vm11, %vm2887_vm0  ;;  %v1317_v17 = vsel %vm3233_vm5, 2143289344, %v1313_v54  ;;  %vm4450_vm13 = vcmp.eq.f32.partialorder %v2504_v12, 3212836864  ;;  %vm1414_vm11 = vcmp.eq.f32.partialorder %v2547_v27, 3212836864  ;;  %vm4452_vm15 = vcmp.lt.f32.partialorder %v2566_v37, 0 }
 0x126   : > { %v1361_v4 = vsel %vm4450_vm13, 1065353216, %v1359_v8  ;;  %vm4451_vm0 = vmor %vm3133_vm2, %vm3158_vm12  ;;  %vm4455_vm5 = vcmp.eq.f32.partialorder %v2493_v7, 2139095040  ;;  %v1460_v28 = vsel %vm1452_vm7, %v3044_v32, %v1458_v47  ;;  %v799_v44 = vstv %s786_s12  ;;  %s3489_s12 = sld [smem:[#allocation11 + $0x400]] }
 0x127   : > { %v1413_v19 = vsel %vm4451_vm0, 2139095040, %v2135_v29  ;;  %vm3276_vm3 = vmand %vm4452_vm15, %vm1452_vm7  ;;  %v1362_v55 = vsel %vm4455_vm5, %v1361_v4, %v1355_v6  ;;  %v802_v26 = vstv %s788_s13  ;;  %v394_v11 = vadd.f32 1e-10, %v393_v30  ;;  %s3506_s13 = sld [smem:[#allocation11 + $0x401]] }
 0x128   : > { %vm4456_vm2 = vmmov %vm4452_vm15  ;;  %vm4459_vm15 = vcmp.eq.f32.partialorder %v2452_v49, 0  ;;  %vm4460_vm13 = vcmp.eq.f32.partialorder %v2463_v56, 1065353216  ;;  %v1409_v7 = vsel %vm3250_vm10, %v1408_v40, %v1406_v52  ;;  %vm1454_vm7 = vcmp.lt.s32.totalorder %v2613_v48, 0  ;;  %v1878_v54 = vpop.eup %1877 }
 0x129   : > { %vm3289_vm12 = vmxor %vm4456_vm2, %vm1455_vm14  ;;  %vm4461_vm14 = vcmp.lt.f32.partialorder %v2547_v27, 0  ;;  %v1415_v15 = vsel %vm1414_vm11, 1065353216, %v1413_v19  ;;  %1879 = vpow2.f32 %v1487_v2  ;;  %v1552_v9 = vtrunc.f32 %v3258_v42 }
 0x12a   : > { %vm1318_vm0 = vmor %vm4460_vm13, %vm4459_vm15  ;;  %v1420_v32 = vsel %vm4461_vm14, %v3059_v20, %v2899_v13  ;;  %vm4462_vm15 = vcmp.eq.f32.partialorder %v2544_v25, 2139095040  ;;  %v1462_v52 = vxor.u32 2147483648, %v1460_v28  ;;  %v800_v13 = vsub.f32 %v2416_v23, %v799_v44 }
 0x12b   : > { %v1319_v58 = vsel %vm1318_vm0, 1065353216, %v1317_v17  ;;  %v1367_v8 = vsel %vm4462_vm15, %v1366_v33, %v1362_v55  ;;  %vm1466_vm10 = vmor %vm3276_vm3, %vm3289_vm12  ;;  %v803_v20 = vsub.f32 %v2418_v24, %v802_v26  ;;  %vm4463_vm11 = vcmp.ne.f32.partialorder %v2476_v63, %v2476_v63 }
 0x12c   : > { %vm4464_vm0 = vcmp.ne.f32.partialorder %v2504_v12, %v2504_v12  ;;  %vm4467_vm15 = vcmp.eq.f32.partialorder %v2530_v21, 2139095040  ;;  %vm1422_vm13 = vcmp.ne.f32.partialorder %v2547_v27, %v2547_v27  ;;  %vm1453_vm5 = vcmp.eq.f32.partialorder %v2613_v48, 1065353216  ;;  %s846_s9 = smul.f32 15.0, %s3489_s12  ;;  %s3890_s12 = sld [smem:[#allocation13 + $0x202]] }
 0x12d   : > { %vm3323_vm14 = vmor %vm4464_vm0, %vm4463_vm11  ;;  %v1416_v33 = vsel %vm4467_vm15, %v1415_v15, %v1409_v7  ;;  %vm1468_vm2 = vcmp.eq.f32.partialorder %v2613_v48, 3212836864  ;;  %v395_v3 = vmul.f32 1.442695, %v394_v11  ;;  %vm4468_vm9 = vcmp.eq.f32.partialorder %v2452_v49, 1065353216  ;;  %s848_s10 = smul.f32 127.0, %s3506_s13 }
 0x12e   : > { %v1320_v30 = vsel %vm4468_vm9, %v2463_v56, %v1319_v58  ;;  %vm4469_vm11 = vcmp.eq.f32.partialorder %v2476_v63, 0  ;;  %vm4470_vm0 = vcmp.eq.f32.partialorder %v2504_v12, 1065353216  ;;  %vm1476_vm15 = vcmp.ne.f32.partialorder %v2613_v48, %v2613_v48  ;;  %vm1461_vm9 = vmand %vm1454_vm7, %vm2956_vm6 }
 0x12f   : > { %vm3340_vm1 = vmor %vm4470_vm0, %vm4469_vm11  ;;  %v1548_v21 = vtrunc.f32 %v3203_v59  ;;  %v1371_v6 = vsel %vm3323_vm14, 2143289344, %v1367_v8  ;;  %v1467_v49 = vsel %vm1466_vm10, 2139095040, %v2135_v29  ;;  %v1541_v56 = vmul.f32 %v1878_v54, %v3203_v59 }
 0x130   : > { %v1553_v40 = vcvt.f32.s32 %v1552_v9  ;;  %v1421_v47 = vsel %vm1402_vm4, %v1420_v32, %v1416_v33  ;;  %vm4473_vm14 = vcmp.ne.f32.partialorder %v2506_v14, %v2506_v14  ;;  %v1463_v46 = vsel %vm1461_vm9, %v1462_v52, %v1460_v28 }
 0x131   : > { %vm3373_vm6 = vmor %vm1422_vm13, %vm4473_vm14  ;;  %v801_v2 = vmul.f32 %v800_v13, %v800_v13  ;;  %v804_v17 = vmul.f32 %v803_v20, %v803_v20  ;;  %v450_v4 = vsub.f32 0.0, %v1320_v30  ;;  %vm4476_vm3 = vcmp.eq.f32.partialorder %v2506_v14, 0 }
 0x132   : > { %vm4477_vm4 = vcmp.eq.f32.partialorder %v2547_v27, 1065353216  ;;  %vm3389_vm7 = vcmp.eq.s32.totalorder %v1500_v62, 1  ;;  %vm4279_vm10 = vcmp.lt.f32.partialorder %v2913_v51, 0  ;;  %vm4278_vm13 = vcmp.eq.f32.partialorder %v3258_v42, 2139095040 }
 0x133   : > { %vm3383_vm12 = vmor %vm4477_vm4, %vm4476_vm3  ;;  %1881 = vpow2.f32 %v395_v3  ;;  %v1373_v41 = vsel %vm3340_vm1, 1065353216, %v1371_v6  ;;  %v1469_v55 = vsel %vm1468_vm2, 1065353216, %v1467_v49  ;;  %vm4482_vm11 = vcmp.ne.f32.partialorder %v2566_v37, %v2566_v37  ;;  %v1880_v32 = vpop.eup %1879 }
 0x134   : > { %vm3405_vm0 = vmor %vm1476_vm15, %vm4482_vm11  ;;  %vm3410_vm9 = vcmp.ne.f32.partialorder %v3203_v59, %v1548_v21  ;;  %v1425_v28 = vsel %vm3373_vm6, 2143289344, %v1421_v47  ;;  %vm4487_vm1 = vcmp.eq.f32.partialorder %v2616_v50, 2139095040  ;;  %vm4488_vm2 = vcmp.eq.f32.partialorder %v2566_v37, 0 }
 0x135   : > { %v1470_v0 = vsel %vm4487_vm1, %v1469_v55, %v1463_v46  ;;  %vm3424_vm15 = vmor %vm1453_vm5, %vm4488_vm2  ;;  %1883 = vpow2.f32 %v1541_v56  ;;  %v806_v26 = vstv %s3377_s29  ;;  %vm1456_vm14 = vcmp.eq.f32.partialorder %v2678_v5, 2139095040  ;;  %s3870_s29 = sld [smem:[#allocation13 + $0x200]] }
 0x136   : > { %vm4491_vm3 = vmneg %vm3141_vm8  ;;  %vm1506_vm4 = vcmp.eq.f32.partialorder %v2913_v51, 0  ;;  %v1554_v11 = vand.u32 1, %v1553_v40  ;;  %v805_v7 = vadd.f32 %v804_v17, %v801_v2  ;;  %v451_v58 = vadd.f32 1e-10, %v450_v4 }
 0x137   : > { %vm3435_vm6 = vmand %vm3389_vm7, %vm4491_vm3  ;;  %vm4494_vm5 = vcmp.eq.f32.partialorder %v2476_v63, 1065353216  ;;  %vm4495_vm11 = vcmp.lt.f32.partialorder %v2613_v48, 0  ;;  %vm1509_vm7 = vcmp.gt.f32.partialorder %v2970_v22, 1065353216  ;;  %vm1384_vm2 = vcmp.eq.f32.partialorder %v2506_v14, 1065353216 }
 0x138   : > { %v1374_v5 = vsel %vm4494_vm5, %v2504_v12, %v1373_v41  ;;  %v1474_v15 = vsel %vm4495_vm11, %v3121_v61, %v2986_v31  ;;  %vm3452_vm1 = vmand %vm4279_vm10, %vm3141_vm8  ;;  %v1427_v63 = vsel %vm3383_vm12, 1065353216, %v1425_v28  ;;  %v3468_v31 = vmul.f32 %v806_v26, %v805_v7 }
 0x139   : > { %v1475_v12 = vsel %vm1456_vm14, %v1474_v15, %v1470_v0  ;;  %vm3464_vm3 = vmor %vm3410_vm9, %vm4278_vm13  ;;  %v542_v18 = vstv %s3414_s19  ;;  %vm1497_vm8 = vcmp.lt.f32.partialorder %v2942_v34, 1266679808  ;;  %vm4500_vm5 = vcmp.lt.f32.partialorder %v2901_v10, 0  ;;  %s1162_s19 = sadd.f32 -0.406, %s3890_s12  ;;  %s4043_s12 = sld [smem:[#allocation4 + $0x6]] }
 0x13a   : > { %v1513_v54 = vsel %vm4500_vm5, 2139095040, %v2135_v29  ;;  %vm4501_vm12 = vmmov %vm4500_vm5  ;;  %v510_v13 = vsub.f32 0.0, %v1374_v5  ;;  %v1512_v20 = vsel %vm3452_vm1, 2143289344, %v1880_v32  ;;  %vm3502_vm13 = vcmp.eq.s32.totalorder %v1554_v11, 1 }
 0x13b   : > { %vm3479_vm14 = vmand %vm4501_vm12, %vm1506_vm4  ;;  %vm1547_vm12 = vcmp.lt.f32.partialorder %v3203_v59, 0  ;;  %v452_v3 = vmul.f32 1.442695, %v451_v58  ;;  %v1428_v30 = vsel %vm1384_vm2, %v2547_v27, %v1427_v63  ;;  %v1479_v1 = vsel %vm3405_vm0, 2143289344, %v1475_v12 }
 0x13c   : > { %vm4504_vm9 = vmmov %vm4500_vm5  ;;  %v3516_v21 = vand.u32 2147483647, %v3468_v31  ;;  %v3518_v6 = vstv %s554_s3  ;;  %vm1438_vm1 = vcmp.eq.f32.partialorder %v2566_v37, 1065353216  ;;  %vm1559_vm0 = vcmp.lt.f32.partialorder %v3028_v57, 0  ;;  %s3883_s3 = sld [smem:[#allocation13 + $0x201]] }
 0x13d   : > { %v3486_v52 = vsel %vm4504_vm9, 0, %v2136_v39  ;;  %vm4505_vm11 = vmmov %vm4500_vm5  ;;  %vm1508_vm2 = vcmp.lt.s32.totalorder %v2913_v51, 0  ;;  %v1514_v49 = vsel %vm1506_vm4, %v1513_v54, %v1512_v20  ;;  %v1579_v56 = vsel %vm1547_vm12, 0, %v2136_v39  ;;  %v1882_v40 = vpop.eup %1881 }
 0x13e   : > { %vm3497_vm5 = vmxor %vm4505_vm11, %vm1509_vm7  ;;  %v1526_v27 = vxor.u32 2147483648, %v3486_v52  ;;  %1885 = vlog2.f32 %v3516_v21  ;;  %v511_v47 = vadd.f32 1e-10, %v510_v13  ;;  %v570_v35 = vsub.f32 0.0, %v1428_v30 }
 0x13f   : > { %vm1556_vm7 = vmneg %vm3464_vm3  ;;  %v1481_v46 = vsel %vm3424_vm15, 1065353216, %v1479_v1  ;;  %v3553_v17 = vstv %s790_s14  ;;  %v1884_v4 = vpop.eup %1883  ;;  %1887 = vpow2.f32 %v452_v3  ;;  %vm1522_vm4 = vcmp.eq.f32.partialorder %v2913_v51, 3212836864 }
 0x140   : > { %vm3525_vm9 = vmand %vm1497_vm8, %vm3435_vm6  ;;  %vm1531_vm8 = vcmp.ne.f32.partialorder %v2901_v10, %v2901_v10  ;;  %vm1551_vm15 = vcmp.lt.f32.partialorder %v3258_v42, 1266679808  ;;  %v3568_v19 = vand.u32 2147483647, %v3553_v17  ;;  %v1516_v41 = vxor.u32 2147483648, %v1514_v49 }
 0x141   : > { %vm1520_vm11 = vmor %vm3479_vm14, %vm3497_vm5  ;;  %v1527_v55 = vsel %vm3525_vm9, %v1526_v27, %v3486_v52  ;;  %v1567_v16 = vsel %vm1547_vm12, 2139095040, %v2135_v29  ;;  %v1482_v62 = vsel %vm1438_vm1, %v2613_v48, %v1481_v46  ;;  %v1580_v37 = vxor.u32 2147483648, %v1579_v56 }
 0x142   : > { %vm3549_vm6 = vmand %vm3502_vm13, %vm1556_vm7  ;;  %vm1560_vm13 = vcmp.eq.f32.partialorder %v3028_v57, 0  ;;  %v1521_v0 = vsel %vm1520_vm11, 2139095040, %v2135_v29  ;;  %vm1563_vm7 = vcmp.gt.f32.partialorder %v3101_v43, 1065353216  ;;  %v3596_v48 = vmul.f32 %v1882_v40, %v2624_v53 }
 0x143   : > { %vm3563_vm10 = vmand %vm1559_vm0, %vm3464_vm3  ;;  %v512_v44 = vmul.f32 1.442695, %v511_v47  ;;  %v571_v26 = vadd.f32 1e-10, %v570_v35  ;;  %vm1491_vm1 = vcmp.eq.f32.partialorder %v2901_v10, 0  ;;  %vm1510_vm14 = vcmp.eq.f32.partialorder %v2970_v22, 2139095040 }
 0x144   : > { %vm3584_vm3 = vmand %vm1508_vm2, %vm3525_vm9  ;;  %v1566_v11 = vsel %vm3563_vm10, 2143289344, %v1884_v4  ;;  %vm1530_vm5 = vcmp.ne.f32.partialorder %v2913_v51, %v2913_v51  ;;  %vm1562_vm11 = vcmp.lt.s32.totalorder %v3028_v57, 0  ;;  %v1606_v7 = vtrunc.f32 %v3568_v19 }
 0x145   : > { %vm3604_vm2 = vmand %vm1551_vm15, %vm3549_vm6  ;;  %v630_v32 = vsub.f32 0.0, %v1482_v62  ;;  %v1517_v58 = vsel %vm3584_vm3, %v1516_v41, %v1514_v49  ;;  %v1523_v5 = vsel %vm1522_vm4, 1065353216, %v1521_v0  ;;  %vm4522_vm10 = vcmp.lt.f32.partialorder %v2913_v51, 0 }
 0x146   : > { %vm3619_vm9 = vmand %vm1547_vm12, %vm1560_vm13  ;;  %v1528_v15 = vsel %vm4522_vm10, %v1527_v55, %v3486_v52  ;;  %v1568_v63 = vsel %vm1560_vm13, %v1567_v16, %v1566_v11  ;;  %vm1576_vm15 = vcmp.eq.f32.partialorder %v3028_v57, 3212836864  ;;  %v1581_v12 = vsel %vm3604_vm2, %v1580_v37, %v1579_v56 }
 0x147   : > { %vm3636_vm6 = vmxor %vm1547_vm12, %vm1563_vm7  ;;  %v1602_v61 = vtrunc.f32 %v3553_v17  ;;  %v399_v54 = vsub.f32 1.0, %v3596_v48  ;;  %1889 = vpow2.f32 %v512_v44  ;;  %v572_v8 = vmul.f32 1.442695, %v571_v26 }
 0x148   : > { %vm1584_vm12 = vcmp.ne.f32.partialorder %v3028_v57, %v3028_v57  ;;  %vm1585_vm4 = vcmp.ne.f32.partialorder %v3203_v59, %v3203_v59  ;;  %v1886_v52 = vpop.eup %1885  ;;  %vm4525_vm13 = vcmp.eq.f32.partialorder %v2942_v34, 2139095040  ;;  %vm1574_vm3 = vmor %vm3619_vm9, %vm3636_vm6  ;;  %v1607_v20 = vcvt.f32.s32 %v1606_v7 }
 0x149   : > { %v1524_v13 = vsel %vm4525_vm13, %v1523_v5, %v1517_v58  ;;  %v859_v25 = vstv %s846_s9  ;;  %v862_v33 = vstv %s848_s10  ;;  %v631_v3 = vadd.f32 1e-10, %v630_v32  ;;  %v1888_v34 = vpop.eup %1887 }
 0x14a   : > { %v1570_v30 = vxor.u32 2147483648, %v1568_v63  ;;  %v3661_v1 = vsel %vm1559_vm0, %v1581_v12, %v1579_v56  ;;  %vm4280_vm7 = vcmp.eq.f32.partialorder %v3568_v19, 2139095040  ;;  %v1595_v14 = vmul.f32 %v1886_v52, %v3553_v17  ;;  %vm3683_vm0 = vmor %vm1530_vm5, %vm1531_vm8 }
 0x14b   : > { %vm3667_vm13 = vcmp.ne.f32.partialorder %v3553_v17, %v1602_v61  ;;  %v860_v49 = vsub.f32 %v2416_v23, %v859_v25  ;;  %v863_v40 = vsub.f32 %v2418_v24, %v862_v33  ;;  %v405_v56 = vmul.f32 0.0, %v399_v54  ;;  %vm1569_vm8 = vmand %vm1562_vm11, %vm3604_vm2 }
 0x14c   : > { %v1529_v47 = vsel %vm1510_vm14, %v1528_v15, %v1524_v13  ;;  %vm1564_vm10 = vcmp.eq.f32.partialorder %v3101_v43, 2139095040  ;;  %v1575_v23 = vsel %vm1574_vm3, 2139095040, %v2135_v29  ;;  %vm1601_vm14 = vcmp.lt.f32.partialorder %v3553_v17, 0  ;;  %vm3715_vm2 = vmor %vm3667_vm13, %vm4280_vm7 }
 0x14d   : > { %1891 = vpow2.f32 %v1595_v14  ;;  %v1608_v24 = vand.u32 1, %v1607_v20  ;;  %vm1614_vm5 = vcmp.eq.f32.partialorder %v3468_v31, 0  ;;  %v861_v22 = vmul.f32 %v860_v49, %v860_v49 }
 0x14e   : > { %v407_v46 = vmul.f32 %v406_v60, %v3596_v48  ;;  %v4530_v2 = vstv %s2576_s20  ;;  %v455_v45 = vmul.f32 %v1888_v34, %v2755_v38  ;;  %vm1545_vm9 = vcmp.eq.f32.partialorder %v3203_v59, 0  ;;  %vm3738_vm13 = vmand %vm1601_vm14, %vm1614_vm5  ;;  %s850_s20 = smul.f32 2.0, %s3657_s27 }
 0x14f   : > { %v415_v4 = vmul.f32 %v4530_v2, %v3596_v48  ;;  %v864_v55 = vmul.f32 %v863_v40, %v863_v40  ;;  %v1533_v60 = vsel %vm3683_vm0, 2143289344, %v1529_v47  ;;  %vm4533_vm11 = vcmp.eq.f32.partialorder %v2913_v51, 1065353216  ;;  %vm1610_vm0 = vmneg %vm3715_vm2 }
 0x150   : > { %vm3725_vm3 = vmor %vm4533_vm11, %vm1491_vm1  ;;  %v1571_v16 = vsel %vm1569_vm8, %v1570_v30, %v1568_v63  ;;  %vm1617_vm6 = vcmp.gt.f32.partialorder %v3516_v21, 1065353216  ;;  %v866_v62 = vstv %s3695_s8  ;;  %v4536_v28 = vstv %s2638_s2  ;;  %s3787_s2 = sld [smem:[#allocation13 + $0x181]]  ;;  %s1158_s8 = sadd.f32 -0.485, %s3870_s29 }
 0x151   : > { %v423_v0 = vmul.f32 %v4536_v28, %v3596_v48  ;;  %1893 = vpow2.f32 %v572_v8  ;;  %v632_v37 = vmul.f32 1.442695, %v631_v3  ;;  %v865_v26 = vadd.f32 %v864_v55, %v861_v22  ;;  %v1890_v32 = vpop.eup %1889  ;;  %s4008_s29 = smul.f32 4.4444447, %s1162_s19  ;;  %s4113_s19 = sld [smem:[#allocation4 + $0x7]] }
 0x152   : > { %v408_v50 = vadd.f32 %v407_v46, %v405_v56  ;;  %v416_v11 = vadd.f32 %v415_v4, %v405_v56  ;;  %v1577_v53 = vsel %vm1576_vm15, 1065353216, %v1575_v23  ;;  %vm3744_vm1 = vcmp.eq.s32.totalorder %v1608_v24, 1  ;;  %vm3761_vm15 = vmxor %vm1601_vm14, %vm1617_vm6 }
 0x153   : > { %v424_v58 = vadd.f32 %v423_v0, %v405_v56  ;;  %v1535_v5 = vsel %vm3725_vm3, 1065353216, %v1533_v60  ;;  %vm4541_vm8 = vcmp.eq.f32.partialorder %v3258_v42, 2139095040  ;;  %v3765_v63 = vmul.f32 %v866_v62, %v865_v26  ;;  %vm3780_vm6 = vmor %vm1584_vm12, %vm1585_vm4 }
 0x154   : > { %v1578_v15 = vsel %vm4541_vm8, %v1577_v53, %v1571_v16  ;;  %v3767_v12 = vsub.f32 1.0, %v455_v45  ;;  %v4544_v61 = vstv %s2691_s16  ;;  %v4545_v52 = vstv %s2714_s0  ;;  %vm3795_vm7 = vmand %vm3744_vm1, %vm1610_vm0  ;;  %s3807_s16 = sld [smem:[#allocation13 + $0x182]]  ;;  %s3822_s0 = sld [smem:[#allocation4 + $0x4]] }
 0x155   : > { %v465_v8 = vmul.f32 %v4544_v61, %v455_v45  ;;  %v474_v13 = vmul.f32 %v4545_v52, %v455_v45  ;;  %vm1546_vm11 = vcmp.eq.f32.partialorder %v3203_v59, 1065353216  ;;  %vm1613_vm3 = vcmp.lt.f32.partialorder %v3468_v31, 0  ;;  %vm1628_vm12 = vmor %vm3738_vm13, %vm3761_vm15 }
 0x156   : > { %v4548_v20 = vstv %s2757_s18  ;;  %vm1605_vm8 = vcmp.lt.f32.partialorder %v3568_v19, 1266679808  ;;  %v1633_v3 = vsel %vm1601_vm14, 0, %v2136_v39  ;;  %v3803_v30 = vand.u32 2147483647, %v3765_v63  ;;  %s1147_s18 = sadd.f32 -0.485, %s3751_s5 }
 0x157   : > { %v483_v25 = vmul.f32 %v4548_v20, %v455_v45  ;;  %v463_v34 = vmul.f32 %v3767_v12, %v408_v50  ;;  %v472_v14 = vmul.f32 %v3767_v12, %v416_v11  ;;  %v1583_v27 = vsel %vm1564_vm10, %v3661_v1, %v1578_v15  ;;  %vm3831_vm10 = vmand %vm1613_vm3, %vm3715_vm2  ;;  %v1892_v35 = vpop.eup %1891  ;;  %s1149_s14 = sadd.f32 -0.456, %s3787_s2  ;;  %s3959_s5 = sld [smem:[#allocation13 + $0x280]] }
 0x158   : > { %v3816_v49 = vstv %s850_s20  ;;  %v481_v40 = vmul.f32 %v3767_v12, %v424_v58  ;;  %v3820_v56 = vmul.f32 %v1890_v32, %v2851_v36  ;;  %vm4551_vm4 = vcmp.eq.f32.partialorder %v2901_v10, 1065353216  ;;  %vm3842_vm1 = vmand %vm1605_vm8, %vm3795_vm7  ;;  %s3951_s20 = sld [smem:[#allocation4 + $0x5]]  ;;  %s3971_s2 = sld [smem:[#allocation13 + $0x281]] }
 0x159   : > { %v1536_v47 = vsel %vm4551_vm4, %v2913_v51, %v1535_v5  ;;  %v3836_v1 = vand.u32 2147483647, %v3816_v49  ;;  %vm1616_vm0 = vcmp.lt.s32.totalorder %v3468_v31, 0  ;;  %v1621_v51 = vsel %vm1601_vm14, 2139095040, %v2135_v29  ;;  %s3931_s10 = smul.f32 4.4642854, %s1149_s14 }
 0x15a   : > { %v1634_v10 = vxor.u32 2147483648, %v1633_v3  ;;  %1895 = vlog2.f32 %v3803_v30  ;;  %v1587_v23 = vsel %vm3780_vm6, 2143289344, %v1583_v27  ;;  %v1629_v24 = vsel %vm1628_vm12, 2139095040, %v2135_v29  ;;  %s1151_s13 = sadd.f32 -0.406, %s3807_s16 }
 0x15b   : > { %1897 = vpow2.f32 %v632_v37  ;;  %vm1630_vm7 = vcmp.eq.f32.partialorder %v3468_v31, 3212836864  ;;  %v466_v22 = vadd.f32 %v465_v8, %v463_v34  ;;  %v475_v46 = vadd.f32 %v474_v13, %v472_v14  ;;  %v1894_v45 = vpop.eup %1893  ;;  %s614_s9 = smul.f32 0.3, %s3822_s0  ;;  %s3981_s0 = sld [smem:[#allocation13 + $0x282]] }
 0x15c   : > { %v690_v2 = vsub.f32 0.0, %v1536_v47  ;;  %vm4556_vm14 = vcmp.eq.f32.partialorder %v3028_v57, 1065353216  ;;  %v1620_v4 = vsel %vm3831_vm10, 2143289344, %v1892_v35  ;;  %v484_v41 = vadd.f32 %v483_v25, %v481_v40  ;;  %s3945_s27 = smul.f32 4.4444447, %s1151_s13 }
 0x15d   : > { %vm1588_vm2 = vmor %vm4556_vm14, %vm1545_vm9  ;;  %v3867_v55 = vsub.f32 1.0, %v3820_v56  ;;  %v1622_v60 = vsel %vm1614_vm5, %v1621_v51, %v1620_v4  ;;  %v1660_v16 = vtrunc.f32 %v3836_v1  ;;  %v1631_v0 = vsel %vm1630_vm7, 1065353216, %v1629_v24  ;;  %s3979_s16 = smul.f32 4.366812, %s1158_s8  ;;  %s1169_s14 = sadd.f32 -0.485, %s3959_s5 }
 0x15e   : > { %vm3878_vm9 = vmand %vm1616_vm0, %vm3842_vm1  ;;  %v1589_v62 = vsel %vm1588_vm2, 1065353216, %v1587_v23  ;;  %v1624_v28 = vxor.u32 2147483648, %v1622_v60  ;;  %v1635_v37 = vsel %vm3842_vm1, %v1634_v10, %v1633_v3  ;;  %vm1618_vm5 = vcmp.eq.f32.partialorder %v3516_v21, 2139095040  ;;  %s1171_s13 = sadd.f32 -0.456, %s3971_s2 }
 0x15f   : > { %vm1638_vm13 = vcmp.ne.f32.partialorder %v3468_v31, %v3468_v31  ;;  %vm1639_vm15 = vcmp.ne.f32.partialorder %v3553_v17, %v3553_v17  ;;  %v1656_v44 = vtrunc.f32 %v3816_v49  ;;  %v523_v26 = vmul.f32 %v3867_v55, %v466_v22  ;;  %s4086_s8 = smul.f32 4.366812, %s1169_s14 }
 0x160   : > { %v4559_v50 = vstv %s2800_s30  ;;  %v691_v53 = vadd.f32 1e-10, %v690_v2  ;;  %v1625_v7 = vsel %vm3878_vm9, %v1624_v28, %v1622_v60  ;;  %v1590_v32 = vsel %vm1546_vm11, %v3028_v57, %v1589_v62  ;;  %s3914_s30 = smul.f32 4.366812, %s1147_s18  ;;  %vm3926_vm11 = vmor %vm1638_vm13, %vm1639_vm15 }
 0x161   : > { %v525_v11 = vmul.f32 %v4559_v50, %v3820_v56  ;;  %vm4560_vm6 = vcmp.eq.f32.partialorder %v3568_v19, 2139095040  ;;  %v1636_v5 = vsel %vm1613_vm3, %v1635_v37, %v1633_v3  ;;  %v1661_v15 = vcvt.f32.s32 %v1660_v16  ;;  %s734_s5 = smul.f32 0.3, %s4043_s12 }
 0x162   : > { %v1632_v58 = vsel %vm4560_vm6, %v1631_v0, %v1625_v7  ;;  %v532_v9 = vmul.f32 %v3867_v55, %v475_v46  ;;  %vm1599_vm8 = vcmp.eq.f32.partialorder %v3553_v17, 0  ;;  %vm1615_vm12 = vcmp.eq.f32.partialorder %v3468_v31, 1065353216 }
 0x163   : > { %v1637_v57 = vsel %vm1618_vm5, %v1636_v5, %v1632_v58  ;;  %v541_v19 = vmul.f32 %v3867_v55, %v484_v41  ;;  %vm1652_vm3 = vcmp.eq.f32.partialorder %v3836_v1, 2139095040  ;;  %vm3937_vm4 = vcmp.ne.f32.partialorder %v3816_v49, %v1656_v44  ;;  %vm1642_vm10 = vmor %vm1615_vm12, %vm1599_vm8 }
 0x164   : > { %v1641_v61 = vsel %vm3926_vm11, 2143289344, %v1637_v57  ;;  %v1896_v8 = vpop.eup %1895  ;;  %v4565_v52 = vstv %s2824_s1  ;;  %v575_v42 = vmul.f32 %v1894_v45, %v3518_v6  ;;  %v692_v20 = vmul.f32 1.442695, %v691_v53  ;;  %s1160_s1 = sadd.f32 -0.456, %s3883_s3  ;;  %vm3966_vm0 = vmor %vm3937_vm4, %vm1652_vm3 }
 0x165   : > { %v534_v13 = vmul.f32 %v4565_v52, %v3820_v56  ;;  %v750_v25 = vsub.f32 0.0, %v1590_v32  ;;  %v1898_v33 = vpop.eup %1897  ;;  %v543_v3 = vmul.f32 %v542_v18, %v3820_v56  ;;  %v634_v34 = vstv %s614_s9  ;;  %vm1664_vm5 = vmneg %vm3966_vm0  ;;  %s674_s3 = smul.f32 0.3, %s3951_s20  ;;  %s4053_s9 = sld [smem:[#allocation13 + $0x300]] }
 0x166   : > { %v1649_v6 = vmul.f32 %v1896_v8, %v3816_v49  ;;  %v1662_v14 = vand.u32 1, %v1661_v15  ;;  %v526_v27 = vadd.f32 %v525_v11, %v523_v26  ;;  %vm1600_vm1 = vcmp.eq.f32.partialorder %v3553_v17, 1065353216  ;;  %s3995_s18 = smul.f32 4.4642854, %s1160_s1 }
 0x167   : > { %v535_v40 = vadd.f32 %v534_v13, %v532_v9  ;;  %v1643_v18 = vsel %vm1642_vm10, 1065353216, %v1641_v61  ;;  %v544_v47 = vadd.f32 %v543_v3, %v541_v19  ;;  %vm1655_vm7 = vcmp.lt.f32.partialorder %v3816_v49, 0  ;;  %s4100_s20 = smul.f32 4.4642854, %s1171_s13  ;;  %s4157_s13 = sld [smem:[#allocation13 + $0x400]] }
 0x168   : > { %1899 = vpow2.f32 %v1649_v6  ;;  %vm1668_vm14 = vcmp.eq.f32.partialorder %v3765_v63, 0  ;;  %v3975_v43 = vsub.f32 1.0, %v575_v42  ;;  %v751_v35 = vadd.f32 1e-10, %v750_v25 }
 0x169   : > { %1901 = vpow2.f32 %v692_v20  ;;  %vm1671_vm2 = vcmp.gt.f32.partialorder %v3803_v30, 1065353216  ;;  %v584_v36 = vstv %s3914_s30  ;;  %v1644_v51 = vsel %vm1600_vm1, %v3468_v31, %v1643_v18  ;;  %vm4002_vm15 = vmand %vm1655_vm7, %vm1668_vm14  ;;  %s4063_s30 = sld [smem:[#allocation13 + $0x301]] }
 0x16a   : > { %vm3986_vm9 = vcmp.eq.s32.totalorder %v1662_v14, 1  ;;  %v583_v23 = vmul.f32 %v3975_v43, %v526_v27  ;;  %v593_v24 = vstv %s3931_s10  ;;  %v602_v22 = vstv %s3945_s27  ;;  %vm4014_vm6 = vmxor %vm1655_vm7, %vm1671_vm2  ;;  %s1173_s10 = sadd.f32 -0.406, %s3981_s0  ;;  %s4070_s27 = sld [smem:[#allocation13 + $0x302]] }
 0x16b   : > { %vm1667_vm13 = vcmp.lt.f32.partialorder %v3765_v63, 0  ;;  %v592_v17 = vmul.f32 %v3975_v43, %v535_v40  ;;  %v601_v46 = vmul.f32 %v3975_v43, %v544_v47  ;;  %v635_v2 = vmul.f32 %v1898_v33, %v634_v34  ;;  %vm4027_vm12 = vmand %vm3986_vm9, %vm1664_vm5  ;;  %s1180_s2 = sadd.f32 -0.485, %s4053_s9  ;;  %s4133_s0 = sld [smem:[#allocation13 + $0x380]] }
 0x16c   : > { %v1687_v45 = vsel %vm1655_vm7, 0, %v2136_v39  ;;  %v585_v41 = vmul.f32 %v584_v36, %v575_v42  ;;  %v752_v60 = vmul.f32 1.442695, %v751_v35  ;;  %v810_v38 = vsub.f32 0.0, %v1644_v51  ;;  %vm4036_vm11 = vmand %vm1667_vm13, %vm3966_vm0  ;;  %s4104_s1 = smul.f32 4.4444447, %s1173_s10 }
 0x16d   : > { %vm1659_vm8 = vcmp.lt.f32.partialorder %v3836_v1, 1266679808  ;;  %v594_v62 = vmul.f32 %v593_v24, %v575_v42  ;;  %v603_v28 = vmul.f32 %v602_v22, %v575_v42  ;;  %v644_v37 = vstv %s3979_s16  ;;  %vm1682_vm4 = vmor %vm4002_vm15, %vm4014_vm6  ;;  %s4153_s14 = smul.f32 4.366812, %s1180_s2  ;;  %s1202_s2 = sadd.f32 -0.485, %s4157_s13 }
 0x16e   : > { %v586_v0 = vadd.f32 %v585_v41, %v583_v23  ;;  %v653_v44 = vstv %s3995_s18  ;;  %v1688_v26 = vxor.u32 2147483648, %v1687_v45  ;;  %v4049_v53 = vsub.f32 1.0, %v635_v2  ;;  %vm4059_vm10 = vmand %vm1659_vm8, %vm4027_vm12  ;;  %s794_s10 = smul.f32 0.3, %s4113_s19 }
 0x16f   : > { %v595_v50 = vadd.f32 %v594_v62, %v592_v17  ;;  %v604_v11 = vadd.f32 %v603_v28, %v601_v46  ;;  %v662_v7 = vstv %s4008_s29  ;;  %1903 = vpow2.f32 %v752_v60  ;;  %s1182_s16 = sadd.f32 -0.456, %s4063_s30  ;;  %s4141_s29 = sld [smem:[#allocation13 + $0x381]] }
 0x170   : > { %v811_v58 = vadd.f32 1e-10, %v810_v38  ;;  %vm1670_vm1 = vcmp.lt.s32.totalorder %v3765_v63, 0  ;;  %v1675_v5 = vsel %vm1655_vm7, 2139095040, %v2135_v29  ;;  %v645_v9 = vmul.f32 %v644_v37, %v635_v2  ;;  %s1184_s18 = sadd.f32 -0.406, %s4070_s27 }
 0x171   : > { %v694_v57 = vstv %s674_s3  ;;  %v1683_v59 = vsel %vm1682_vm4, 2139095040, %v2135_v29  ;;  %vm1684_vm0 = vcmp.eq.f32.partialorder %v3765_v63, 3212836864  ;;  %v643_v61 = vmul.f32 %v4049_v53, %v586_v0  ;;  %vm4094_vm7 = vmand %vm1670_vm1, %vm4059_vm10  ;;  %s4148_s3 = sld [smem:[#allocation13 + $0x382]]  ;;  %s4155_s12 = smul.f32 4.4642854, %s1182_s16 }
 0x172   : > { %v1900_v15 = vpop.eup %1899  ;;  %v654_v21 = vmul.f32 %v653_v44, %v635_v2  ;;  %v1689_v52 = vsel %vm4059_vm10, %v1688_v26, %v1687_v45  ;;  %v652_v13 = vmul.f32 %v4049_v53, %v595_v50  ;;  %v661_v42 = vmul.f32 %v4049_v53, %v604_v11  ;;  %s4159_s9 = smul.f32 4.4444447, %s1184_s18  ;;  %s4162_s30 = sld [smem:[#allocation13 + $0x401]] }
 0x173   : > { %v1902_v19 = vpop.eup %1901  ;;  %v1674_v8 = vsel %vm4036_vm11, 2143289344, %v1900_v15  ;;  %vm1693_vm2 = vcmp.ne.f32.partialorder %v3816_v49, %v3816_v49  ;;  %v812_v25 = vmul.f32 1.442695, %v811_v58  ;;  %v1685_v3 = vsel %vm1684_vm0, 1065353216, %v1683_v59  ;;  %s4166_s27 = sld [smem:[#allocation13 + $0x402]] }
 0x174   : > { %v1676_v29 = vsel %vm1668_vm14, %v1675_v5, %v1674_v8  ;;  %vm1692_vm14 = vcmp.ne.f32.partialorder %v3765_v63, %v3765_v63  ;;  %v663_v34 = vmul.f32 %v662_v7, %v635_v2  ;;  %v695_v6 = vmul.f32 %v1902_v19, %v694_v57 }
 0x175   : > { %v1678_v33 = vxor.u32 2147483648, %v1676_v29  ;;  %vm1672_vm9 = vcmp.eq.f32.partialorder %v3803_v30, 2139095040  ;;  %v1690_v14 = vsel %vm1667_vm13, %v1689_v52, %v1687_v45  ;;  %v457_v27 = vmul.f32 %v3767_v12, %v399_v54  ;;  %vm4128_vm13 = vmor %vm1692_vm14, %vm1693_vm2 }
 0x176   : > { %vm1653_vm5 = vcmp.eq.f32.partialorder %v3816_v49, 0  ;;  %vm1669_vm15 = vcmp.eq.f32.partialorder %v3765_v63, 1065353216  ;;  %v646_v18 = vadd.f32 %v645_v9, %v643_v61  ;;  %v655_v56 = vadd.f32 %v654_v21, %v652_v13 }
 0x177   : > { %v1679_v40 = vsel %vm4094_vm7, %v1678_v33, %v1676_v29  ;;  %v664_v47 = vadd.f32 %v663_v34, %v661_v42  ;;  %1905 = vpow2.f32 %v812_v25  ;;  %v696_v35 = vsub.f32 1.0, %v695_v6 }
 0x178   : > { %v1686_v48 = vsel %vm1652_vm3, %v1685_v3, %v1679_v40  ;;  %v704_v1 = vstv %s4086_s8  ;;  %v713_v36 = vstv %s4100_s20  ;;  %v722_v51 = vstv %s4104_s1  ;;  %vm1696_vm3 = vmor %vm1669_vm15, %vm1653_vm5  ;;  %s4168_s8 = sld [smem:[#allocation4 + $0x8]]  ;;  %s1191_s20 = sadd.f32 -0.485, %s4133_s0 }
 0x179   : > { %v1691_v12 = vsel %vm1672_vm9, %v1690_v14, %v1686_v48  ;;  %v1904_v10 = vpop.eup %1903  ;;  %v517_v23 = vmul.f32 %v3867_v55, %v457_v27  ;;  %v754_v24 = vstv %s734_s5  ;;  %vm1654_vm6 = vcmp.eq.f32.partialorder %v3816_v49, 1065353216  ;;  %s1193_s1 = sadd.f32 -0.456, %s4141_s29 }
 0x17a   : > { %v1695_v30 = vsel %vm4128_vm13, 2143289344, %v1691_v12  ;;  %v703_v22 = vmul.f32 %v696_v35, %v646_v18  ;;  %v712_v31 = vmul.f32 %v696_v35, %v655_v56  ;;  %v721_v17 = vmul.f32 %v696_v35, %v664_v47  ;;  %s1195_s5 = sadd.f32 -0.406, %s4148_s3  ;;  %s822_s19 = smul.f32 4.366812, %s1191_s20 }
 0x17b   : > { %v705_v46 = vmul.f32 %v704_v1, %v695_v6  ;;  %v1697_v2 = vsel %vm1696_vm3, 1065353216, %v1695_v30  ;;  %v714_v55 = vmul.f32 %v713_v36, %v695_v6  ;;  %v723_v4 = vmul.f32 %v722_v51, %v695_v6  ;;  %s831_s16 = smul.f32 4.4642854, %s1193_s1  ;;  %s1204_s0 = sadd.f32 -0.456, %s4162_s30 }
 0x17c   : > { %v755_v49 = vmul.f32 %v1904_v10, %v754_v24  ;;  %v1698_v45 = vsel %vm1654_vm6, %v3765_v63, %v1697_v2  ;;  %v577_v41 = vmul.f32 %v3975_v43, %v517_v23  ;;  %v764_v63 = vstv %s4153_s14  ;;  %s840_s18 = smul.f32 4.4444447, %s1195_s5  ;;  %s1206_s29 = sadd.f32 -0.406, %s4166_s27 }
 0x17d   : > { %v870_v60 = vsub.f32 0.0, %v1698_v45  ;;  %v706_v38 = vadd.f32 %v705_v46, %v703_v22  ;;  %v715_v16 = vadd.f32 %v714_v55, %v712_v31  ;;  %v724_v62 = vadd.f32 %v723_v4, %v721_v17  ;;  %s882_s14 = smul.f32 4.366812, %s1202_s2 }
 0x17e   : > { %v756_v39 = vsub.f32 1.0, %v755_v49  ;;  %v773_v0 = vstv %s4155_s12  ;;  %v637_v43 = vmul.f32 %v4049_v53, %v577_v41  ;;  %v782_v44 = vstv %s4159_s9  ;;  %s854_s3 = smul.f32 0.3, %s4168_s8 }
 0x17f   : > { %v871_v28 = vadd.f32 1e-10, %v870_v60  ;;  %v814_v26 = vstv %s794_s10  ;;  %v765_v58 = vmul.f32 %v764_v63, %v755_v49  ;;  %v774_v5 = vmul.f32 %v773_v0, %v755_v49  ;;  %s891_s12 = smul.f32 4.4642854, %s1204_s0 }
 0x180   : > { %v763_v11 = vmul.f32 %v756_v39, %v706_v38  ;;  %v772_v7 = vmul.f32 %v756_v39, %v715_v16  ;;  %v781_v32 = vmul.f32 %v756_v39, %v724_v62  ;;  %v783_v15 = vmul.f32 %v782_v44, %v755_v49  ;;  %s900_s13 = smul.f32 4.4444447, %s1206_s29 }
 0x181   : > { %v1906_v37 = vpop.eup %1905  ;;  %v872_v50 = vmul.f32 1.442695, %v871_v28  ;;  %v697_v53 = vmul.f32 %v696_v35, %v637_v43  ;;  %v824_v8 = vstv %s822_s19  ;;  %v833_v52 = vstv %s831_s16 }
 0x182   : > { %v815_v9 = vmul.f32 %v1906_v37, %v814_v26  ;;  %v766_v57 = vadd.f32 %v765_v58, %v763_v11  ;;  %v775_v59 = vadd.f32 %v774_v5, %v772_v7  ;;  %v784_v19 = vadd.f32 %v783_v15, %v781_v32 }
 0x183   : > { %1907 = vpow2.f32 %v872_v50  ;;  %v757_v21 = vmul.f32 %v756_v39, %v697_v53  ;;  %v842_v13 = vstv %s840_s18  ;;  %v874_v25 = vstv %s854_s3 }
 0x184   : > { %v816_v61 = vsub.f32 1.0, %v815_v9  ;;  %v825_v33 = vmul.f32 %v824_v8, %v815_v9  ;;  %v834_v3 = vmul.f32 %v833_v52, %v815_v9  ;;  %v843_v34 = vmul.f32 %v842_v13, %v815_v9 }
 0x185   : > { %v884_v27 = vstv %s882_s14  ;;  %v893_v40 = vstv %s891_s12  ;;  %v902_v18 = vstv %s900_s13 }
 0x186   : > { %v823_v42 = vmul.f32 %v816_v61, %v766_v57  ;;  %v832_v29 = vmul.f32 %v816_v61, %v775_v59  ;;  %v841_v20 = vmul.f32 %v816_v61, %v784_v19  ;;  %v817_v14 = vmul.f32 %v816_v61, %v757_v21 }
 0x188   : > { %v826_v56 = vadd.f32 %v825_v33, %v823_v42  ;;  %v835_v47 = vadd.f32 %v834_v3, %v832_v29  ;;  %v844_v48 = vadd.f32 %v843_v34, %v841_v20 }
 0x18d   : > { %v1908_v6 = vpop.eup %1907 }
 0x18e   : > { %v875_v54 = vmul.f32 %v1908_v6, %v874_v25 }
 0x190   : > { %v876_v12 = vsub.f32 1.0, %v875_v54  ;;  %v885_v35 = vmul.f32 %v884_v27, %v875_v54  ;;  %v894_v1 = vmul.f32 %v893_v40, %v875_v54  ;;  %v903_v36 = vmul.f32 %v902_v18, %v875_v54 }
 0x192   : > { %v877_v51 = vmul.f32 %v876_v12, %v817_v14  ;;  %v883_v10 = vmul.f32 %v876_v12, %v826_v56  ;;  %v892_v23 = vmul.f32 %v876_v12, %v835_v47  ;;  %v901_v24 = vmul.f32 %v876_v12, %v844_v48 }
 0x194   : > { %v886_v30 = vadd.f32 %v885_v35, %v883_v10  ;;  %v895_v22 = vadd.f32 %v894_v1, %v892_v23  ;;  %v904_v31 = vadd.f32 %v903_v36, %v901_v24  ;;  %v905_v17 = vmul.f32 0.229, %v877_v51 }
 0x195   : > { %v910_v46 = vmul.f32 0.224, %v877_v51  ;;  %v917_v2 = vmul.f32 0.225, %v877_v51 }
 0x196   : > { %906 = vst [vmem:[#allocation2] sm:$0xff] %v905_v17  ;;  %v907_v55 = vmul.f32 0.229, %v886_v30  ;;  %v913_v4 = vmul.f32 0.224, %v895_v22 }
 0x197   : > { %v920_v49 = vmul.f32 0.225, %v904_v31  ;;  %912 = vst [vmem:[#allocation2 + $0x8] sm:$0xff] %v910_v46  ;;  %919 = vst [vmem:[#allocation2 + $0x10] sm:$0xff] %v917_v2 }
 0x198   : > { %v908_v45 = vadd.f32 0.485, %v907_v55  ;;  %v914_v41 = vadd.f32 0.456, %v913_v4 }
 0x199   : > { %v921_v60 = vadd.f32 0.406, %v920_v49 }
 0x19a   : > { %909 = vst [vmem:[#allocation3] sm:$0xff] %v908_v45  ;;  %916 = vst [vmem:[#allocation3 + $0x8] sm:$0xff] %v914_v41 }
 0x19b   : > { %923 = vst [vmem:[#allocation3 + $0x10] sm:$0xff] %v921_v60 }
 0x19c PF: > { %v924_v38 = vld [vmem:[%s2402_s17] sm:$0xff]  ;;  %s1699_s9 = smul.u32 6, %s2108_s24  ;;  %v925_v39 = vld [vmem:[%s2402_s17 + $0x8] sm:$0xff]  ;;  %s957_s30 = sshll.u32 %s2409_s7, 4  ;;  %v926_v43 = vld [vmem:[%s2402_s17 + $0x10] sm:$0xff]  ;;  %s4187_s30 = int_to_ptr.vmem [resolvable:$true] %s957_s30 }
 0x19d   : > { %v927_v16 = vld [vmem:[#allocation2] sm:$0xff]  ;;  %s943_s17 = scalar_lea.sflag [#allocation6], %s2398_s4  ;;  %s2137_s1 = smov [#allocation15]  }
 0x19e   : > { %v930_v28 = vmul.f32 %v927_v16, %v924_v38  ;;  %v928_v63 = vld [vmem:[#allocation2 + $0x8] sm:$0xff]  ;;  %v929_v44 = vld [vmem:[#allocation2 + $0x10] sm:$0xff]  ;;  %s954_s10 = sadd.s32 %s2112_s25, %s1699_s9  ;;  %s2014_s25 = scalar_lea.vmem %s4187_s30, 384 }
 0x19f   : > { %v931_v37 = vmul.f32 %v928_v63, %v925_v39  ;;  %v932_v11 = vmul.f32 %v929_v44, %v926_v43  ;;  %s1207_s27 = sshll.u32 %s954_s10, 7  ;;  %p2015_p1 = scmp.ne.s32.totalorder %s4187_s30, %s2014_s25 }
 0x1a0   : > { %s4193_s20 = scalar_lea.hbm %s4255_s6, %s1207_s27  ;;  %s2018_s5 = sshll.u32 %s2137_s1, 4  ;;  %s2019_s5 = int_to_ptr.vmem [resolvable:$false] %s2018_s5 }
 0x1a1   : > { %v933_v62 = vld [vmem:[#allocation3] sm:$0xff]  ;;  %v934_v0 = vld [vmem:[#allocation3 + $0x8] sm:$0xff]  ;;  %p2016_p10 = pnand %p2015_p1, %p2319_p4  ;;  %s2020_s19 = scalar_lea.vmem %s2019_s5, 768 }
 0x1a2   : > { %v935_v26 = vld [vmem:[#allocation3 + $0x10] sm:$0xff]  ;;  %v936_v50 = vadd.f32 %v933_v62, %v930_v28  ;;  %v937_v7 = vadd.f32 %v934_v0, %v931_v37  ;;  %p2021_p8 = scmp.lt.s32.totalorder %s4187_s30, %s2019_s5  ;;  %p2022_p5 = scmp.lt.s32.totalorder %s2020_s19, %s2014_s25 }
 0x1a3   : > { %v938_v32 = vadd.f32 %v935_v26, %v932_v11  ;;  %p2017_p6 = pneg %p2016_p10 }
 0x1a4   : > { %939 = vst [vmem:[%s2409_s7] sm:$0xff] %v936_v50  ;;  %940 = vst [vmem:[%s2409_s7 + $0x8] sm:$0xff] %v937_v7  ;;  %p2023_p2 = por %p2022_p5, %p2021_p8 }
 0x1a5   : > { %941 = vst [vmem:[%s2409_s7 + $0x10] sm:$0xff] %v938_v32 }
 0x1a6   : > { %p2024_p12 = pnand %p2023_p2, %p2017_p6 }
 0x1a8   : > { %2027 = shalt.err (!%p2024_p12)
}
 0x1a9   : > { %s2028_s7 = scalar_lea.hbm %s4193_s20, 384  ;;  %s2032_s0 = scalar_lea.hbm %s4255_s6, 1536 }
 0x1aa   : > { %p2029_p11 = scmp.ne.s32.totalorder %s4193_s20, %s2028_s7  ;;  %p2033_p9 = scmp.lt.u32.totalorder %s4193_s20, %s4255_s6 }
 0x1ab   : > { %p2034_p0 = scmp.lt.u32.totalorder %s2032_s0, %s2028_s7  ;;  %p2036_p1 = scmp.lt.u32.totalorder %s2028_s7, %s4193_s20 }
 0x1ac   : > { %p2030_p13 = pnand %p2029_p11, %p2319_p4 }
 0x1ad   : > { %p2035_p3 = por %p2034_p0, %p2033_p9 }
 0x1ae   : > { %p2031_p7 = pneg %p2030_p13 }
 0x1af   : > { %p2037_p10 = por %p2036_p1, %p2035_p3 }
 0x1b1   : > { %p2038_p6 = pnand %p2037_p10, %p2031_p7 }
 0x1b3   : > { %2041 = shalt.err (!%p2038_p6)
}
 0x1b4   : > { %s2138_s3 = smov 128   ;;  %s2139_s14 = smov 256  }
 0x1b5   : > { %s2140_s12 = smov 8  }
 0x1b6   : > { %1722 = dma.vmem_to_hbm [thread:$0]  (%p2319_p4), %s4187_s30, 384, %s4193_s20, %s943_s17, %s2138_s3, %s2139_s14, %s2140_s12  }
 0x1b7 PF: > { %s4584_s13 = sld [smem:[#allocation22_spill]]  ;;  %p1759_p8 = scmp.ge.s32.totalorder %s2124_s28, 2 }
 0x1b8   : > { %s972_s9 = sand.u32 1, %s2096_s21  }
 0x1b9   : > { %s973_s10 = scalar_lea.sflag [#allocation6], %s972_s9 }
 0x1bd   : > { %p4585_p5 = scmp.ne.s32.totalorder %s4584_s13, 0 }
 0x1bf   : > { %p1745_p2 = pnand %p1759_p8, %p4585_p5 }
 0x1c1   : > { %2091 = dma.done.wait (!%p1745_p2), %s973_s10, 384  }
 0x1c2   : > { %2093 = vsyncadd (!%p1745_p2), %s973_s10, 4294966912  ;;  %s25_s28 = sadd.s32 1, %s2124_s28   ;;  %s4586_s25 = sld [smem:[#allocation21_spill]] }
 0x1c3   : > { %p22_p12 = scmp.ge.s32.totalorder %s25_s28, 6   ;;  %s4587_s11 = sld [smem:[#allocation23_spill]] }
 0x1c4   : > { %s4588_s27 = sld [smem:[#allocation24_spill]]  ;;  %s4589_s21 = smov %s2100_s22 }
 0x1c5   : > { %s4590_s22 = smov %s2104_s23  ;;  %s4591_s23 = smov %s2336_s15 }
 0x1c6   : > { %s4592_s24 = smov %s2116_s26  ;;  %24 = sbr.rel (!%p22_p12) target bundleno = 17 (0x11), region = 118 }
 0x1c9   : > { %s4593_s26 = smov %s4587_s11 }
 0x1cd   :  { %978 = vsyncpa [#allocation5], 1 }
 0x1ce   :  { %980 = vsyncpa [#allocation5 + $0x1], 1 }
 0x1cf   :  { %981 = vsyncpa [#allocation6], 1 }
 0x1d0   :  { %983 = vsyncpa [#allocation6 + $0x1], 1 }
 0x1d1   :  { %984 = vsyncpa [#allocation7], 1 }
 0x1d2   :  { %986 = vsyncpa [#allocation7 + $0x1], 1 }
 0x1d3   :  { %987 = vsyncpa [#allocation9], 1 }
 0x1d4   :  { %988 = vsyncpa [#allocation12], 1 }

</bundles_post_ra>
